<compile_context>
chip_gen: v6e
topology: v6e:2x2x1
jax: 0.10.0
libtpu: 0.0.40
codegen_flags: <defaults>
</compile_context>

<pallas_src>
import functools

import jax
import jax.numpy as jnp
from jax.experimental import pallas as pl
from jax.experimental.pallas import tpu as pltpu


# --------------------------------------------------------------------------
# Kernel A: expand 1x1 (+BN0+swish) -> padded depthwise conv (+BN1+swish)
#           -> SE spatial-sum epilogue.  One (image, channel-chunk) per step.
# --------------------------------------------------------------------------
def _expand_dw_kernel(*refs, k, stride, H, W, ph0, pw0, Ho, Wo, has_expand):
    if has_expand:
        x_ref, we_ref, b0_ref, wdw_ref, b1_ref, y_ref, pool_ref, xp_ref = refs
    else:
        x_ref, wdw_ref, b1_ref, y_ref, pool_ref, xp_ref = refs
        we_ref = b0_ref = None
    tc = wdw_ref.shape[-1]

    # Build the zero-padded ("same" padding) expanded tile in VMEM scratch.
    xp_ref[...] = jnp.zeros(xp_ref.shape, xp_ref.dtype)
    if has_expand:
        cin = x_ref.shape[-1]
        # Expand 1x1 conv as a matmul (BN0 scale pre-folded into the weight,
        # bf16 MXU operands, f32 accumulation) + bias + swish.
        x2d = x_ref[0].reshape(H * W, cin).astype(jnp.bfloat16)
        h = jnp.dot(x2d, we_ref[...], preferred_element_type=jnp.float32)
        h = h + b0_ref[...]
        h = h * jax.nn.sigmoid(h)                       # swish (f32 VPU/EUP)
        h = h.reshape(H, W, tc)
    else:
        h = x_ref[0].astype(jnp.float32)
    xp_ref[ph0:ph0 + H, pw0:pw0 + W, :] = h

    # Depthwise conv (BN1 scale pre-folded into the taps), stride-aware.
    w = wdw_ref[...].astype(jnp.float32)                # (k, k, tc)
    acc = jnp.zeros((Ho, Wo, tc), jnp.float32)
    for ki in range(k):
        for kj in range(k):
            if stride == 1:
                tap = xp_ref[ki:ki + Ho, kj:kj + Wo, :]
            else:
                # Strided taps: output computed directly at stride > 1.
                tap = xp_ref[pl.ds(ki, Ho, stride), pl.ds(kj, Wo, stride), :]
            acc = acc + tap * w[ki, kj][None, None, :]
    y = acc + b1_ref[...]
    y = y * jax.nn.sigmoid(y)                           # swish
    y_ref[0] = y.astype(y_ref.dtype)
    # Fused SE global-average-pool epilogue (spatial sum; 1/(Ho*Wo) is folded
    # into the SE-reduce weight on the host).
    pool_ref[...] = jnp.sum(y, axis=(0, 1), keepdims=True)


def fused_expand_dwconv(x_nhwc, w_exp, b0, w_dw, b1, *, k, stride):
    N, H, W, Cin = x_nhwc.shape
    Coup = w_dw.shape[-1]
    has_expand = w_exp is not None

    # TF-style "same" padding (Conv2dDynamicSamePadding semantics).
    def same_pad(size):
        out = -(-size // stride)
        pad = max((out - 1) * stride + k - size, 0)
        return out, pad // 2, pad - pad // 2

    Ho, ph0, ph1 = same_pad(H)
    Wo, pw0, pw1 = same_pad(W)
    Hp, Wp = H + ph0 + ph1, W + pw0 + pw1

    # Channel tiling: full channel set when it fits a 128-lane vreg row, else
    # 128-channel chunks; whole spatial extent per block.
    # TODO(synk): add H-row tiling with a halo for very large spatial sizes so
    # per-block VMEM stays bounded on v7x (64 MiB) / v5e (16 MiB default).
    tc = Coup if Coup <= 128 else 128
    grid = (N, pl.cdiv(Coup, tc))

    if has_expand:
        in_specs = [
            pl.BlockSpec((1, H, W, Cin), lambda n, c: (n, 0, 0, 0)),
            pl.BlockSpec((Cin, tc), lambda n, c: (0, c)),
            pl.BlockSpec((1, tc), lambda n, c: (0, c)),
        ]
        args = [x_nhwc, w_exp, b0]
    else:
        in_specs = [pl.BlockSpec((1, H, W, tc), lambda n, c: (n, 0, 0, c))]
        args = [x_nhwc]
    in_specs += [
        pl.BlockSpec((k, k, tc), lambda n, c: (0, 0, c)),
        pl.BlockSpec((1, tc), lambda n, c: (0, c)),
    ]
    args += [w_dw, b1]

    kernel = functools.partial(
        _expand_dw_kernel, k=k, stride=stride, H=H, W=W,
        ph0=ph0, pw0=pw0, Ho=Ho, Wo=Wo, has_expand=has_expand)

    y, pooled = pl.pallas_call(
        kernel,
        out_shape=(jax.ShapeDtypeStruct((N, Ho, Wo, Coup), x_nhwc.dtype),
                   jax.ShapeDtypeStruct((N, 1, Coup), jnp.float32)),
        grid=grid,
        in_specs=in_specs,
        out_specs=(pl.BlockSpec((1, Ho, Wo, tc), lambda n, c: (n, 0, 0, c)),
                   pl.BlockSpec((1, 1, tc), lambda n, c: (n, 0, c))),
        scratch_shapes=[pltpu.VMEM((Hp, Wp, tc), jnp.float32)],
        compiler_params=pltpu.CompilerParams(
            dimension_semantics=("parallel", "parallel")),
    )(*args)
    return y, pooled, (Ho, Wo)


# --------------------------------------------------------------------------
# Kernel B: SE gate from the pooled vector (two tiny matmuls + sigmoid).
# --------------------------------------------------------------------------
def _se_gate_kernel(p_ref, wr_ref, br_ref, we_ref, be_ref, o_ref):
    n, _, c = p_ref.shape
    p = p_ref[...].reshape(n, c)                        # (N, C) spatial sums
    s = jnp.dot(p, wr_ref[...], preferred_element_type=jnp.float32) + br_ref[...]
    s = s * jax.nn.sigmoid(s)                           # swish
    e = jnp.dot(s, we_ref[...], preferred_element_type=jnp.float32) + be_ref[...]
    o_ref[...] = jax.nn.sigmoid(e).reshape(n, 1, c)


def se_gate(pooled, wr, br, we, be):
    N, _, C = pooled.shape
    Csq = wr.shape[1]
    return pl.pallas_call(
        _se_gate_kernel,
        out_shape=jax.ShapeDtypeStruct((N, 1, C), jnp.float32),
        grid=(1,),
        in_specs=[
            pl.BlockSpec((N, 1, C), lambda i: (0, 0, 0)),
            pl.BlockSpec((C, Csq), lambda i: (0, 0)),
            pl.BlockSpec((1, Csq), lambda i: (0, 0)),
            pl.BlockSpec((Csq, C), lambda i: (0, 0)),
            pl.BlockSpec((1, C), lambda i: (0, 0)),
        ],
        out_specs=pl.BlockSpec((N, 1, C), lambda i: (0, 0, 0)),
    )(pooled, wr, br, we, be)


# --------------------------------------------------------------------------
# Kernel C: projection 1x1 (+folded BN2) with fused SE gate and residual add.
# --------------------------------------------------------------------------
def _proj_kernel(*refs, has_gate, has_res):
    if has_gate and has_res:
        h_ref, g_ref, w_ref, b_ref, r_ref, o_ref = refs
    elif has_gate:
        h_ref, g_ref, w_ref, b_ref, o_ref = refs
        r_ref = None
    elif has_res:
        h_ref, w_ref, b_ref, r_ref, o_ref = refs
        g_ref = None
    else:
        h_ref, w_ref, b_ref, o_ref = refs
        g_ref = r_ref = None

    h = h_ref[0].astype(jnp.float32)                    # (tm, K)
    if has_gate:
        h = h * g_ref[0]                                # SE gate, per-image (1, K)
    y = jnp.dot(h.astype(jnp.bfloat16), w_ref[...],     # bf16 MXU, f32 accum
                preferred_element_type=jnp.float32)
    y = y + b_ref[...]
    if has_res:
        y = y + r_ref[0].astype(jnp.float32)
    o_ref[0] = y.astype(o_ref.dtype)


def conv1x1_proj(h3d, w_bf16, bias, gate=None, residual=None, tm=512):
    N, HW, K = h3d.shape
    Cout = w_bf16.shape[1]
    tm = HW if HW <= tm else tm                         # large, 8-aligned tiles
    grid = (N, pl.cdiv(HW, tm))

    in_specs = [pl.BlockSpec((1, tm, K), lambda n, m: (n, m, 0))]
    args = [h3d]
    if gate is not None:
        in_specs.append(pl.BlockSpec((1, 1, K), lambda n, m: (n, 0, 0)))
        args.append(gate)
    in_specs += [pl.BlockSpec((K, Cout), lambda n, m: (0, 0)),
                 pl.BlockSpec((1, Cout), lambda n, m: (0, 0))]
    args += [w_bf16, bias]
    io_alias = {}
    if residual is not None:
        in_specs.append(pl.BlockSpec((1, tm, Cout), lambda n, m: (n, m, 0)))
        args.append(residual)
        io_alias = {len(args) - 1: 0}                   # write output in place

    kernel = functools.partial(_proj_kernel, has_gate=gate is not None,
                               has_res=residual is not None)
    return pl.pallas_call(
        kernel,
        out_shape=jax.ShapeDtypeStruct((N, HW, Cout), h3d.dtype),
        grid=grid,
        in_specs=in_specs,
        out_specs=pl.BlockSpec((1, tm, Cout), lambda n, m: (n, m, 0)),
        input_output_aliases=io_alias,
        compiler_params=pltpu.CompilerParams(
            dimension_semantics=("parallel", "parallel")),
    )(*args)


# --------------------------------------------------------------------------
# MBConvBlock forward (Pallas)
# --------------------------------------------------------------------------
def mbconv_forward_pallas(x_nchw, P, cfg):
    eps = cfg["bn_eps"]
    k = cfg["kernel_size"]
    s = cfg["stride"]
    N, Cin, H, W = x_nchw.shape
    x_nhwc = jnp.transpose(x_nchw, (0, 2, 3, 1))

    def fold(g, b, m, v):
        inv = g / jnp.sqrt(v + eps)
        return inv, b - m * inv

    has_expand = cfg["expand_ratio"] != 1
    if has_expand:
        sc0, bi0 = fold(*P["bn0"])
        # BN0 scale folded into the expand weight; bf16 MXU operand.
        w_exp = (P["w_exp"][:, :, 0, 0].T * sc0[None, :]).astype(jnp.bfloat16)
        b0 = bi0.reshape(1, -1).astype(jnp.float32)
        Coup = w_exp.shape[1]
    else:
        w_exp, b0 = None, None
        Coup = Cin

    sc1, bi1 = fold(*P["bn1"])
    # BN1 scale folded into the depthwise taps (kept f32 for the VPU path).
    w_dw = (jnp.transpose(P["w_dw"][:, 0, :, :], (1, 2, 0))
            * sc1[None, None, :]).astype(jnp.float32)   # (k, k, Coup)
    b1 = bi1.reshape(1, -1).astype(jnp.float32)

    y4d, pooled, (Ho, Wo) = fused_expand_dwconv(
        x_nhwc, w_exp, b0, w_dw, b1, k=k, stride=s)

    gate = None
    if cfg["has_se"]:
        # 1/(Ho*Wo) folded into the SE-reduce weight (pooled holds sums).
        wr = (P["w_se_r"][:, :, 0, 0].T / float(Ho * Wo)).astype(jnp.float32)
        we = P["w_se_e"][:, :, 0, 0].T.astype(jnp.float32)
        gate = se_gate(pooled, wr,
                       P["b_se_r"].reshape(1, -1).astype(jnp.float32),
                       we, P["b_se_e"].reshape(1, -1).astype(jnp.float32))

    sc2, bi2 = fold(*P["bn2"])
    w_proj = (P["w_proj"][:, :, 0, 0].T * sc2[None, :]).astype(jnp.bfloat16)
    b2 = bi2.reshape(1, -1).astype(jnp.float32)
    Cout = w_proj.shape[1]

    residual = None
    if cfg["id_skip"] and s == 1 and Cin == Cout:
        residual = x_nhwc.reshape(N, H * W, Cin)

    out3d = conv1x1_proj(y4d.reshape(N, Ho * Wo, Coup), w_proj, b2,
                         gate=gate, residual=residual)
    out = out3d.reshape(N, Ho, Wo, Cout)
    return jnp.transpose(out, (0, 3, 1, 2))             # back to NCHW


# --------------------------------------------------------------------------
# Plain-JAX reference (mirrors the PyTorch forward in NCHW, eval-mode BN)
# --------------------------------------------------------------------------
def _swish(x):
    return x * jax.nn.sigmoid(x)


def _conv_nchw(x, w, stride=1, groups=1, bias=None):
    out = jax.lax.conv_general_dilated(
        x, w, window_strides=(stride, stride), padding="VALID",
        dimension_numbers=("NCHW", "OIHW", "NCHW"),
        feature_group_count=groups, precision=jax.lax.Precision.HIGHEST)
    if bias is not None:
        out = out + bias[None, :, None, None]
    return out


def mbconv_forward_reference(x, P, cfg):
    eps = cfg["bn_eps"]
    k = cfg["kernel_size"]
    s = cfg["stride"]

    def bn(h, g, b, m, v):
        return ((h - m[None, :, None, None]) / jnp.sqrt(v + eps)[None, :, None, None]
                * g[None, :, None, None] + b[None, :, None, None])

    h = x
    if cfg["expand_ratio"] != 1:
        h = _swish(bn(_conv_nchw(h, P["w_exp"]), *P["bn0"]))
    _, C, H, W = h.shape

    def pads(size):
        out = -(-size // s)
        p = max((out - 1) * s + k - size, 0)
        return (p // 2, p - p // 2)

    hp = jnp.pad(h, ((0, 0), (0, 0), pads(H), pads(W)))
    h = _swish(bn(_conv_nchw(hp, P["w_dw"], stride=s, groups=C), *P["bn1"]))
    if cfg["has_se"]:
        se = jnp.mean(h, axis=(2, 3), keepdims=True)
        se = _swish(_conv_nchw(se, P["w_se_r"], bias=P["b_se_r"]))
        se = _conv_nchw(se, P["w_se_e"], bias=P["b_se_e"])
        h = jax.nn.sigmoid(se) * h
    h = bn(_conv_nchw(h, P["w_proj"]), *P["bn2"])
    if cfg["id_skip"] and s == 1 and cfg["input_filters"] == cfg["output_filters"]:
        h = h + x
    return h


# --------------------------------------------------------------------------
# Main
# --------------------------------------------------------------------------
if __name__ == "__main__":
    # Block configuration (small, MBConv-style): expand_ratio=4, k=3, s=1,
    # se_ratio=0.25, id_skip=True, input_filters == output_filters.
    cfg = dict(
        input_filters=8, output_filters=8, expand_ratio=4, kernel_size=3,
        stride=1, se_ratio=0.25, id_skip=True, bn_eps=1e-3, has_se=True,
    )
    inp = cfg["input_filters"]
    oup = inp * cfg["expand_ratio"]
    nsq = max(1, int(inp * cfg["se_ratio"]))
    k = cfg["kernel_size"]
    N, H, W = 2, 16, 16

    key = jax.random.PRNGKey(0)
    ks = jax.random.split(key, 20)

    def bn_params(k0, k1, k2, k3, c):
        gamma = 1.0 + 0.1 * jax.random.normal(k0, (c,), jnp.float32)
        beta = 0.1 * jax.random.normal(k1, (c,), jnp.float32)
        mean = 0.05 * jax.random.normal(k2, (c,), jnp.float32)
        var = 0.5 + 0.2 * jnp.abs(jax.random.normal(k3, (c,), jnp.float32))
        return (gamma, beta, mean, var)

    P = {
        "w_exp": 0.1 * jax.random.normal(ks[0], (oup, inp, 1, 1), jnp.float32),
        "bn0": bn_params(ks[1], ks[2], ks[3], ks[4], oup),
        "w_dw": 0.1 * jax.random.normal(ks[5], (oup, 1, k, k), jnp.float32),
        "bn1": bn_params(ks[6], ks[7], ks[8], ks[9], oup),
        "w_se_r": 0.1 * jax.random.normal(ks[10], (nsq, oup, 1, 1), jnp.float32),
        "b_se_r": 0.05 * jax.random.normal(ks[11], (nsq,), jnp.float32),
        "w_se_e": 0.1 * jax.random.normal(ks[12], (oup, nsq, 1, 1), jnp.float32),
        "b_se_e": 0.05 * jax.random.normal(ks[13], (oup,), jnp.float32),
        "w_proj": 0.1 * jax.random.normal(ks[14], (cfg["output_filters"], oup, 1, 1), jnp.float32),
        "bn2": bn_params(ks[15], ks[16], ks[17], ks[18], cfg["output_filters"]),
    }

    x = jax.random.normal(ks[19], (N, inp, H, W), jnp.float32)   # NCHW input

    out = mbconv_forward_pallas(x, P, cfg)
    out = jax.block_until_ready(out)

    ref = jax.block_until_ready(mbconv_forward_reference(x, P, cfg))
    assert out.shape == ref.shape, (out.shape, ref.shape)
    # Tolerance accounts for intentional bf16 MXU operands (f32 accumulation)
    # in the Pallas path vs Precision.HIGHEST f32 in the reference.
    assert jnp.allclose(out, ref, atol=1e-2, rtol=1e-2), float(jnp.max(jnp.abs(out - ref)))

    print("KERNEL_OK")
</pallas_src>

<mosaic_0001>
module attributes {stable_mosaic.version = 11 : i64} {
  func.func @_expand_dw_kernel(%arg0: i32, %arg1: i32, %arg2: memref<1x16x16x8xf32, #tpu.memory_space<vmem>>, %arg3: memref<8x32xbf16, #tpu.memory_space<vmem>>, %arg4: memref<1x32xf32, #tpu.memory_space<vmem>>, %arg5: memref<3x3x32xf32, #tpu.memory_space<vmem>>, %arg6: memref<1x32xf32, #tpu.memory_space<vmem>>, %arg7: memref<1x16x16x32xf32, #tpu.memory_space<vmem>>, %arg8: memref<1x1x32xf32, #tpu.memory_space<vmem>>, %arg9: memref<18x18x32xf32, #tpu.memory_space<vmem>>) attributes {dimension_semantics = [#tpu.dimension_semantics<parallel>, #tpu.dimension_semantics<parallel>], iteration_bounds = array<i64: 2, 1>, scalar_prefetch = 0 : i64, scratch_operands = 1 : i64, tpu.core_type = #tpu.core_type<tc>, window_params = [{transform_indices = @transform_0, window_bounds = array<i64: 1, 16, 16, 8>}, {transform_indices = @transform_1, window_bounds = array<i64: 8, 32>}, {transform_indices = @transform_2, window_bounds = array<i64: 1, 32>}, {transform_indices = @transform_3, window_bounds = array<i64: 3, 3, 32>}, {transform_indices = @transform_4, window_bounds = array<i64: 1, 32>}, {transform_indices = @transform_5, window_bounds = array<i64: 1, 16, 16, 32>}, {transform_indices = @transform_6, window_bounds = array<i64: 1, 1, 32>}]} {
    %cst = arith.constant 0.000000e+00 : f32
    %0 = vector.broadcast %cst : f32 to vector<18x18x32xf32>
    %c0 = arith.constant 0 : index
    %c0_0 = arith.constant 0 : index
    %c0_1 = arith.constant 0 : index
    %1 = vector.load %arg9[%c0, %c0_0, %c0_1] : memref<18x18x32xf32, #tpu.memory_space<vmem>>, vector<18x18x32xf32>
    tpu.vector_store %arg9[%c0, %c0_0, %c0_1], %0 {strides = array<i32>} : memref<18x18x32xf32, #tpu.memory_space<vmem>>, vector<18x18x32xf32>,
    %c0_2 = arith.constant 0 : index
    %c0_3 = arith.constant 0 : index
    %c0_4 = arith.constant 0 : index
    %c0_5 = arith.constant 0 : index
    %2 = vector.load %arg2[%c0_2, %c0_3, %c0_4, %c0_5] : memref<1x16x16x8xf32, #tpu.memory_space<vmem>>, vector<1x16x16x8xf32>
    %3 = vector.shape_cast %2 : vector<1x16x16x8xf32> to vector<16x16x8xf32>
    %4 = vector.shape_cast %3 : vector<16x16x8xf32> to vector<256x8xf32>
    %5 = arith.truncf %4 : vector<256x8xf32> to vector<256x8xbf16>
    %c0_6 = arith.constant 0 : index
    %c0_7 = arith.constant 0 : index
    %6 = vector.load %arg3[%c0_6, %c0_7] : memref<8x32xbf16, #tpu.memory_space<vmem>>, vector<8x32xbf16>
    %cst_8 = arith.constant dense<0.000000e+00> : vector<256x32xf32>
    %7 = tpu.matmul %5, %6, %cst_8 {dimension_numbers = #tpu.dot_dimension_numbers<[1], [0], [0], [1], [0, 0, 1, 1], [], []>} : vector<256x8xbf16>, vector<8x32xbf16>, vector<256x32xf32> -> vector<256x32xf32>
    %c0_9 = arith.constant 0 : index
    %c0_10 = arith.constant 0 : index
    %8 = vector.load %arg4[%c0_9, %c0_10] : memref<1x32xf32, #tpu.memory_space<vmem>>, vector<1x32xf32>
    %9 = vector.broadcast %8 : vector<1x32xf32> to vector<256x32xf32>
    %10 = arith.addf %7, %9 : vector<256x32xf32>
    %11 = arith.negf %10 : vector<256x32xf32>
    %12 = math.exp %11 : vector<256x32xf32>
    %cst_11 = arith.constant 1.000000e+00 : f32
    %13 = vector.broadcast %cst_11 : f32 to vector<256x32xf32>
    %14 = arith.addf %13, %12 : vector<256x32xf32>
    %15 = arith.divf %13, %14 : vector<256x32xf32>
    %16 = arith.mulf %10, %15 : vector<256x32xf32>
    %17 = vector.shape_cast %16 : vector<256x32xf32> to vector<16x16x32xf32>
    %c1 = arith.constant 1 : index
    %c1_12 = arith.constant 1 : index
    %c0_13 = arith.constant 0 : index
    %18 = vector.load %arg9[%c1, %c1_12, %c0_13] : memref<18x18x32xf32, #tpu.memory_space<vmem>>, vector<16x16x32xf32>
    tpu.vector_store %arg9[%c1, %c1_12, %c0_13], %17 {strides = array<i32>} : memref<18x18x32xf32, #tpu.memory_space<vmem>>, vector<16x16x32xf32>,
    %c0_14 = arith.constant 0 : index
    %c0_15 = arith.constant 0 : index
    %c0_16 = arith.constant 0 : index
    %19 = vector.load %arg5[%c0_14, %c0_15, %c0_16] : memref<3x3x32xf32, #tpu.memory_space<vmem>>, vector<3x3x32xf32>
    %cst_17 = arith.constant 0.000000e+00 : f32
    %20 = vector.broadcast %cst_17 : f32 to vector<16x16x32xf32>
    %c0_18 = arith.constant 0 : index
    %c0_19 = arith.constant 0 : index
    %c0_20 = arith.constant 0 : index
    %21 = vector.load %arg9[%c0_18, %c0_19, %c0_20] : memref<18x18x32xf32, #tpu.memory_space<vmem>>, vector<16x16x32xf32>
    %22 = vector.extract_strided_slice %19 {offsets = [0, 0, 0], sizes = [1, 1, 32], strides = [1, 1, 1]} : vector<3x3x32xf32> to vector<1x1x32xf32>
    %23 = vector.shape_cast %22 : vector<1x1x32xf32> to vector<32xf32>
    %24 = vector.shape_cast %23 : vector<32xf32> to vector<1x1x32xf32>
    %25 = vector.broadcast %24 : vector<1x1x32xf32> to vector<16x16x32xf32>
    %26 = arith.mulf %21, %25 : vector<16x16x32xf32>
    %27 = arith.addf %20, %26 : vector<16x16x32xf32>
    %c0_21 = arith.constant 0 : index
    %c1_22 = arith.constant 1 : index
    %c0_23 = arith.constant 0 : index
    %28 = vector.load %arg9[%c0_21, %c1_22, %c0_23] : memref<18x18x32xf32, #tpu.memory_space<vmem>>, vector<16x16x32xf32>
    %29 = vector.extract_strided_slice %19 {offsets = [0, 1, 0], sizes = [1, 1, 32], strides = [1, 1, 1]} : vector<3x3x32xf32> to vector<1x1x32xf32>
    %30 = vector.shape_cast %29 : vector<1x1x32xf32> to vector<32xf32>
    %31 = vector.shape_cast %30 : vector<32xf32> to vector<1x1x32xf32>
    %32 = vector.broadcast %31 : vector<1x1x32xf32> to vector<16x16x32xf32>
    %33 = arith.mulf %28, %32 : vector<16x16x32xf32>
    %34 = arith.addf %27, %33 : vector<16x16x32xf32>
    %c0_24 = arith.constant 0 : index
    %c2 = arith.constant 2 : index
    %c0_25 = arith.constant 0 : index
    %35 = vector.load %arg9[%c0_24, %c2, %c0_25] : memref<18x18x32xf32, #tpu.memory_space<vmem>>, vector<16x16x32xf32>
    %36 = vector.extract_strided_slice %19 {offsets = [0, 2, 0], sizes = [1, 1, 32], strides = [1, 1, 1]} : vector<3x3x32xf32> to vector<1x1x32xf32>
    %37 = vector.shape_cast %36 : vector<1x1x32xf32> to vector<32xf32>
    %38 = vector.shape_cast %37 : vector<32xf32> to vector<1x1x32xf32>
    %39 = vector.broadcast %38 : vector<1x1x32xf32> to vector<16x16x32xf32>
    %40 = arith.mulf %35, %39 : vector<16x16x32xf32>
    %41 = arith.addf %34, %40 : vector<16x16x32xf32>
    %c1_26 = arith.constant 1 : index
    %c0_27 = arith.constant 0 : index
    %c0_28 = arith.constant 0 : index
    %42 = vector.load %arg9[%c1_26, %c0_27, %c0_28] : memref<18x18x32xf32, #tpu.memory_space<vmem>>, vector<16x16x32xf32>
    %43 = vector.extract_strided_slice %19 {offsets = [1, 0, 0], sizes = [1, 1, 32], strides = [1, 1, 1]} : vector<3x3x32xf32> to vector<1x1x32xf32>
    %44 = vector.shape_cast %43 : vector<1x1x32xf32> to vector<32xf32>
    %45 = vector.shape_cast %44 : vector<32xf32> to vector<1x1x32xf32>
    %46 = vector.broadcast %45 : vector<1x1x32xf32> to vector<16x16x32xf32>
    %47 = arith.mulf %42, %46 : vector<16x16x32xf32>
    %48 = arith.addf %41, %47 : vector<16x16x32xf32>
    %c1_29 = arith.constant 1 : index
    %c1_30 = arith.constant 1 : index
    %c0_31 = arith.constant 0 : index
    %49 = vector.load %arg9[%c1_29, %c1_30, %c0_31] : memref<18x18x32xf32, #tpu.memory_space<vmem>>, vector<16x16x32xf32>
    %50 = vector.extract_strided_slice %19 {offsets = [1, 1, 0], sizes = [1, 1, 32], strides = [1, 1, 1]} : vector<3x3x32xf32> to vector<1x1x32xf32>
    %51 = vector.shape_cast %50 : vector<1x1x32xf32> to vector<32xf32>
    %52 = vector.shape_cast %51 : vector<32xf32> to vector<1x1x32xf32>
    %53 = vector.broadcast %52 : vector<1x1x32xf32> to vector<16x16x32xf32>
    %54 = arith.mulf %49, %53 : vector<16x16x32xf32>
    %55 = arith.addf %48, %54 : vector<16x16x32xf32>
    %c1_32 = arith.constant 1 : index
    %c2_33 = arith.constant 2 : index
    %c0_34 = arith.constant 0 : index
    %56 = vector.load %arg9[%c1_32, %c2_33, %c0_34] : memref<18x18x32xf32, #tpu.memory_space<vmem>>, vector<16x16x32xf32>
    %57 = vector.extract_strided_slice %19 {offsets = [1, 2, 0], sizes = [1, 1, 32], strides = [1, 1, 1]} : vector<3x3x32xf32> to vector<1x1x32xf32>
    %58 = vector.shape_cast %57 : vector<1x1x32xf32> to vector<32xf32>
    %59 = vector.shape_cast %58 : vector<32xf32> to vector<1x1x32xf32>
    %60 = vector.broadcast %59 : vector<1x1x32xf32> to vector<16x16x32xf32>
    %61 = arith.mulf %56, %60 : vector<16x16x32xf32>
    %62 = arith.addf %55, %61 : vector<16x16x32xf32>
    %c2_35 = arith.constant 2 : index
    %c0_36 = arith.constant 0 : index
    %c0_37 = arith.constant 0 : index
    %63 = vector.load %arg9[%c2_35, %c0_36, %c0_37] : memref<18x18x32xf32, #tpu.memory_space<vmem>>, vector<16x16x32xf32>
    %64 = vector.extract_strided_slice %19 {offsets = [2, 0, 0], sizes = [1, 1, 32], strides = [1, 1, 1]} : vector<3x3x32xf32> to vector<1x1x32xf32>
    %65 = vector.shape_cast %64 : vector<1x1x32xf32> to vector<32xf32>
    %66 = vector.shape_cast %65 : vector<32xf32> to vector<1x1x32xf32>
    %67 = vector.broadcast %66 : vector<1x1x32xf32> to vector<16x16x32xf32>
    %68 = arith.mulf %63, %67 : vector<16x16x32xf32>
    %69 = arith.addf %62, %68 : vector<16x16x32xf32>
    %c2_38 = arith.constant 2 : index
    %c1_39 = arith.constant 1 : index
    %c0_40 = arith.constant 0 : index
    %70 = vector.load %arg9[%c2_38, %c1_39, %c0_40] : memref<18x18x32xf32, #tpu.memory_space<vmem>>, vector<16x16x32xf32>
    %71 = vector.extract_strided_slice %19 {offsets = [2, 1, 0], sizes = [1, 1, 32], strides = [1, 1, 1]} : vector<3x3x32xf32> to vector<1x1x32xf32>
    %72 = vector.shape_cast %71 : vector<1x1x32xf32> to vector<32xf32>
    %73 = vector.shape_cast %72 : vector<32xf32> to vector<1x1x32xf32>
    %74 = vector.broadcast %73 : vector<1x1x32xf32> to vector<16x16x32xf32>
    %75 = arith.mulf %70, %74 : vector<16x16x32xf32>
    %76 = arith.addf %69, %75 : vector<16x16x32xf32>
    %c2_41 = arith.constant 2 : index
    %c2_42 = arith.constant 2 : index
    %c0_43 = arith.constant 0 : index
    %77 = vector.load %arg9[%c2_41, %c2_42, %c0_43] : memref<18x18x32xf32, #tpu.memory_space<vmem>>, vector<16x16x32xf32>
    %78 = vector.extract_strided_slice %19 {offsets = [2, 2, 0], sizes = [1, 1, 32], strides = [1, 1, 1]} : vector<3x3x32xf32> to vector<1x1x32xf32>
    %79 = vector.shape_cast %78 : vector<1x1x32xf32> to vector<32xf32>
    %80 = vector.shape_cast %79 : vector<32xf32> to vector<1x1x32xf32>
    %81 = vector.broadcast %80 : vector<1x1x32xf32> to vector<16x16x32xf32>
    %82 = arith.mulf %77, %81 : vector<16x16x32xf32>
    %83 = arith.addf %76, %82 : vector<16x16x32xf32>
    %c0_44 = arith.constant 0 : index
    %c0_45 = arith.constant 0 : index
    %84 = vector.load %arg6[%c0_44, %c0_45] : memref<1x32xf32, #tpu.memory_space<vmem>>, vector<1x32xf32>
    %85 = vector.shape_cast %84 : vector<1x32xf32> to vector<1x1x32xf32>
    %86 = vector.broadcast %85 : vector<1x1x32xf32> to vector<16x16x32xf32>
    %87 = arith.addf %83, %86 : vector<16x16x32xf32>
    %88 = arith.negf %87 : vector<16x16x32xf32>
    %89 = math.exp %88 : vector<16x16x32xf32>
    %cst_46 = arith.constant 1.000000e+00 : f32
    %90 = vector.broadcast %cst_46 : f32 to vector<16x16x32xf32>
    %91 = arith.addf %90, %89 : vector<16x16x32xf32>
    %92 = arith.divf %90, %91 : vector<16x16x32xf32>
    %93 = arith.mulf %87, %92 : vector<16x16x32xf32>
    %c0_47 = arith.constant 0 : index
    %c0_48 = arith.constant 0 : index
    %c0_49 = arith.constant 0 : index
    %c0_50 = arith.constant 0 : index
    %94 = vector.load %arg7[%c0_47, %c0_48, %c0_49, %c0_50] : memref<1x16x16x32xf32, #tpu.memory_space<vmem>>, vector<1x16x16x32xf32>
    %95 = vector.shape_cast %94 : vector<1x16x16x32xf32> to vector<16x16x32xf32>
    %96 = vector.shape_cast %93 : vector<16x16x32xf32> to vector<1x16x16x32xf32>
    tpu.vector_store %arg7[%c0_47, %c0_48, %c0_49, %c0_50], %96 {strides = array<i32>} : memref<1x16x16x32xf32, #tpu.memory_space<vmem>>, vector<1x16x16x32xf32>,
    %cst_51 = arith.constant dense<0.000000e+00> : vector<32xf32>
    %97 = vector.multi_reduction <add>, %93, %cst_51 [0, 1] : vector<16x16x32xf32> to vector<32xf32>
    %98 = vector.shape_cast %97 : vector<32xf32> to vector<1x1x32xf32>
    %c0_52 = arith.constant 0 : index
    %c0_53 = arith.constant 0 : index
    %c0_54 = arith.constant 0 : index
    %99 = vector.load %arg8[%c0_52, %c0_53, %c0_54] : memref<1x1x32xf32, #tpu.memory_space<vmem>>, vector<1x1x32xf32>
    tpu.vector_store %arg8[%c0_52, %c0_53, %c0_54], %98 {strides = array<i32>} : memref<1x1x32xf32, #tpu.memory_space<vmem>>, vector<1x1x32xf32>,
    return
  }
  func.func @transform_0(%arg0: i32, %arg1: i32) -> (i32, i32, i32, i32) {
    %c0_i32 = arith.constant 0 : i32
    %c0_i32_0 = arith.constant 0 : i32
    %c0_i32_1 = arith.constant 0 : i32
    %c0_i32_2 = arith.constant 0 : i32
    return %arg0, %c0_i32, %c0_i32_0, %c0_i32_1 : i32, i32, i32, i32
  }
  func.func @transform_1(%arg0: i32, %arg1: i32) -> (i32, i32) {
    %c0_i32 = arith.constant 0 : i32
    %c0_i32_0 = arith.constant 0 : i32
    return %c0_i32, %arg1 : i32, i32
  }
  func.func @transform_2(%arg0: i32, %arg1: i32) -> (i32, i32) {
    %c0_i32 = arith.constant 0 : i32
    %c0_i32_0 = arith.constant 0 : i32
    return %c0_i32, %arg1 : i32, i32
  }
  func.func @transform_3(%arg0: i32, %arg1: i32) -> (i32, i32, i32) {
    %c0_i32 = arith.constant 0 : i32
    %c0_i32_0 = arith.constant 0 : i32
    %c0_i32_1 = arith.constant 0 : i32
    return %c0_i32, %c0_i32_0, %arg1 : i32, i32, i32
  }
  func.func @transform_4(%arg0: i32, %arg1: i32) -> (i32, i32) {
    %c0_i32 = arith.constant 0 : i32
    %c0_i32_0 = arith.constant 0 : i32
    return %c0_i32, %arg1 : i32, i32
  }
  func.func @transform_5(%arg0: i32, %arg1: i32) -> (i32, i32, i32, i32) {
    %c0_i32 = arith.constant 0 : i32
    %c0_i32_0 = arith.constant 0 : i32
    %c0_i32_1 = arith.constant 0 : i32
    return %arg0, %c0_i32, %c0_i32_0, %arg1 : i32, i32, i32, i32
  }
  func.func @transform_6(%arg0: i32, %arg1: i32) -> (i32, i32, i32) {
    %c0_i32 = arith.constant 0 : i32
    %c0_i32_0 = arith.constant 0 : i32
    return %arg0, %c0_i32, %arg1 : i32, i32, i32
  }
}

</mosaic_0001>

<bundles_post_ra>
// kernel: tpu_custom_call.1
= control target key start
LH: loop header
LB: loop body
LE: loop exit
PB: predicated region body
PF: predicated region fallthrough
CT: control target
= control target key end

     0   :  { %12 = vsyncpa [#allocation4], 0  ;;  %s4759_s0 = inlined_call_operand.vmem [shape: f32[2,16,16,8], index: 0, kind: input, shape index: {}]   ;;  %s4760_s1 = inlined_call_operand.vmem [shape: bf16[8,32], index: 1, kind: input, shape index: {}]   ;;  %s4761_s2 = inlined_call_operand.vmem [shape: f32[1,32], index: 2, kind: input, shape index: {}]   ;;  %s4762_s3 = inlined_call_operand.vmem [shape: f32[3,3,32], index: 3, kind: input, shape index: {}]   ;;  %s4763_s4 = inlined_call_operand.vmem [shape: f32[1,32], index: 4, kind: input, shape index: {}]   ;;  %s4764_s5 = inlined_call_operand.hbm [shape: f32[2,16,16,32], index: 5, kind: output, shape index: {0}]   ;;  %s4765_s6 = inlined_call_operand.hbm [shape: f32[2,1,32], index: 6, kind: output, shape index: {1}]  }
   0x1   :  { %14 = vsyncpa [#allocation4 + $0x1], 0 }
   0x2   :  { %15 = vsyncpa [#allocation6], 0 }
   0x3   :  { %17 = vsyncpa [#allocation6 + $0x1], 0  ;;  %s3017_s21 = smov 0   ;;  %s3019_s22 = smov 0  }
   0x4   :  { %s3021_s23 = smov 0   ;;  %s3023_s24 = smov 0  }
   0x5   :  { %s3025_s25 = smov 0   ;;  %s3027_s26 = smov 0  }
   0x6 LB: > { %s2380_s27 = sadd.s32 4294967295, %s2975_s26   ;;  %s2381_s28 = sadd.s32 4294967294, %s2975_s26   ;;  %s2975_s26 = sphi %s3027_s26, %s23_s26   ;;  %s2971_s25 = sphi %s3025_s25, %s4982_s25   ;;  %s2967_s24 = sphi %s3023_s24, %s4981_s24   ;;  %s2963_s23 = sphi %s3021_s23, %s4980_s23   ;;  %s2959_s22 = sphi %s3019_s22, %s4979_s22   ;;  %s2955_s21 = sphi %s3017_s21, %s4978_s21  }
   0x7   : > { %s35_s29 = sadd.s32 1, %s2971_s25  ;;  %s174_s30 = sadd.s32 1, %s2963_s23 }
   0x8   : > { %p37_p0 = scmp.ge.s32.totalorder %s35_s29, 2  ;;  %p184_p1 = scmp.ne.s32.totalorder %s2963_s23, %s2959_s22 }
   0x9   : > { %p185_p2 = scmp.eq.s32.totalorder %s2380_s27, 1  ;;  %p190_p3 = scmp.ne.s32.totalorder %s2959_s22, %s2955_s21 }
   0xa   : > { %s4984_s29 = smov (%p37_p0, %s35_s29), 0  ;;  %p191_p5 = scmp.eq.s32.totalorder %s2381_s28, 1 }
   0xb   : > { %p3057_p4 = por %p185_p2, %p184_p1  ;;  %s169_s8 = ssub.s32 %s2971_s25, %s4984_s29 }
   0xc   : > { %p2388_p6 = scmp.ge.s32.totalorder %s2975_s26, 1  ;;  %p172_p7 = scmp.eq.s32.totalorder %s169_s8, 0 }
   0xd   : > { %p3064_p8 = por %p191_p5, %p190_p3  ;;  %p271_p9 = scmp.lt.s32.totalorder %s2975_s26, 3 }
   0xe   : > { %s3070_s10 = scalar_select %p172_p7, %s2963_s23, %s174_s30  }
   0xf   : > { %p272_p10 = pnand %p2388_p6, %p271_p9 }
  0x11   : > { %275 = sbr.rel (%p272_p10) target bundleno = 578 (0x242), region = 40 }
  0x16   : > { %v443_v0 = vld [vmem:[%s4760_s1] sm:$0xf]  ;;  %vm500_vm0 = vcmask 1043456   ;;  %p319_p11 = scmp.lt.s32.totalorder %s2967_s24, 1  ;;  %vm339_vm1 = vcmask 261120   ;;  %v2977_v2 = vmov 0.0  }
  0x17   : > { %2535 = vmatprep.subr.msk.bf16.mxu0 %vm500_vm0, %v443_v0  ;;  %2536 = vmatprep.subr.msk.bf16.mxu1 %vm500_vm0, %v443_v0  ;;  %v502_v1 = vsel %vm500_vm0, %v443_v0, 0  ;;  %347 = vst.msk [vmem:[#allocation2 + $0x30] sm:$0xff] %vm339_vm1, %v2977_v2  ;;  %348 = vst.msk [vmem:[#allocation2 + $0x38] sm:$0xff] %vm339_vm1, %v2977_v2  ;;  %vm451_vm2 = vcmask 64512   ;;  %vm342_vm3 = vcmask 254976   ;;  %s2481_s19 = sshll.u32 %s2967_s24, 12 }
  0x18   : > { %2500 = vmatpush3.bf16.msra.mxu0 %v502_v1  ;;  %2534 = vmatpush3.bf16.msra.mxu1 %v502_v1  ;;  %s3077_s13 = scalar_select %p319_p11, %s2967_s24, 1  ;;  %340 = vst.msk [vmem:[#allocation2] sm:$0xff] %vm339_vm1, %v2977_v2  ;;  %341 = vst.msk [vmem:[#allocation2 + $0x8] sm:$0xff] %vm339_vm1, %v2977_v2  ;;  %v3244_v51 = vld [vmem:[%s4761_s2] ss:$0 sm:$0xff] }
  0x19   : > { %344 = vst.msk [vmem:[#allocation2 + $0x18] sm:$0xff] %vm339_vm1, %v2977_v2  ;;  %345 = vst.msk [vmem:[#allocation2 + $0x20] sm:$0xff] %vm339_vm1, %v2977_v2  ;;  %s4673_s30 = scalar_lea.hbm %s4764_s5, %s2481_s19  ;;  %s2978_s12 = smov [#allocation3]  }
  0x1a   : > { %350 = vst.msk [vmem:[#allocation2 + $0x48] sm:$0xff] %vm339_vm1, %v2977_v2  ;;  %351 = vst.msk [vmem:[#allocation2 + $0x50] sm:$0xff] %vm339_vm1, %v2977_v2  ;;  %s2480_s14 = sshll.u32 %s3077_s13, 8  ;;  %s2873_s13 = sshll.u32 %s2978_s12, 4  ;;  %s2874_s13 = int_to_ptr.vmem [resolvable:$false] %s2873_s13 }
  0x1b   : > { %353 = vst.msk [vmem:[#allocation2 + $0x60] sm:$0xff] %vm339_vm1, %v2977_v2  ;;  %354 = vst.msk [vmem:[#allocation2 + $0x68] sm:$0xff] %vm339_vm1, %v2977_v2  ;;  %s3155_s17 = scalar_lea.vmem %s4759_s0, %s2480_s14  ;;  %s3728_s14 = sand.u32 1, %s2959_s22  }
  0x1c   : > { %356 = vst.msk [vmem:[#allocation2 + $0x78] sm:$0xff] %vm339_vm1, %v2977_v2  ;;  %357 = vst.msk [vmem:[#allocation2 + $0x80] sm:$0xff] %vm339_vm1, %v2977_v2  ;;  %v395_v3 = vld [vmem:[%s3155_s17] sm:$0xff]  ;;  %v396_v4 = vld [vmem:[%s3155_s17 + $0x8] sm:$0xff]  ;;  %s2389_s15 = sshll.u32 %s3728_s14, 8  ;;  %s2193_s8 = scalar_lea.sflag [#allocation4], %s3728_s14 }
  0x1d   : > { %359 = vst.msk [vmem:[#allocation2 + $0x90] sm:$0xff] %vm339_vm1, %v2977_v2  ;;  %360 = vst.msk [vmem:[#allocation2 + $0x98] sm:$0xff] %vm339_vm1, %v2977_v2  ;;  %v411_v5 = vld [vmem:[%s3155_s17 + $0x80] sm:$0xff]  ;;  %v427_v6 = vpack.c.bf16 %v396_v4, %v395_v3  ;;  %v412_v7 = vld [vmem:[%s3155_s17 + $0x88] sm:$0xff]  ;;  %s3802_s16 = scalar_lea.vmem [#allocation3], %s2389_s15  ;;  %s2875_s15 = scalar_lea.vmem %s2874_s13, 8192 }
  0x1e   : > { %362 = vst.msk [vmem:[#allocation2 + $0xa8] sm:$0xff] %vm339_vm1, %v2977_v2  ;;  %363 = vst.msk [vmem:[#allocation2 + $0xb0] sm:$0xff] %vm339_vm1, %v2977_v2  ;;  %v397_v8 = vld [vmem:[%s3155_s17 + $0x10] sm:$0xff]  ;;  %v398_v9 = vld [vmem:[%s3155_s17 + $0x18] sm:$0xff]  ;;  %v435_v10 = vpack.c.bf16 %v412_v7, %v411_v5  ;;  %s2211_s20 = sshll.u32 %s3802_s16, 4  ;;  %s4675_s20 = int_to_ptr.vmem [resolvable:$true] %s2211_s20 }
  0x1f   : > { %365 = vst.msk [vmem:[#allocation2 + $0xc0] sm:$0xff] %vm339_vm1, %v2977_v2  ;;  %366 = vst.msk [vmem:[#allocation2 + $0xc8] sm:$0xff] %vm339_vm1, %v2977_v2  ;;  %v428_v11 = vpack.c.bf16 %v398_v9, %v397_v8  ;;  %v413_v12 = vld [vmem:[%s3155_s17 + $0x90] sm:$0xff]  ;;  %v414_v13 = vld [vmem:[%s3155_s17 + $0x98] sm:$0xff]  ;;  %2501 = vmatprep.mubr.msk.bf16.mxu0 %vm451_vm2, %v427_v6  ;;  %s2869_s11 = scalar_lea.vmem %s4675_s20, 4096  ;;  %p2876_p1 = scmp.lt.s32.totalorder %s4675_s20, %s2874_s13 }
  0x20   : > { %368 = vst.msk [vmem:[#allocation2 + $0xd8] sm:$0xff] %vm339_vm1, %v2977_v2  ;;  %369 = vst.msk [vmem:[#allocation2 + $0xe0] sm:$0xff] %vm339_vm1, %v2977_v2  ;;  %v399_v14 = vld [vmem:[%s3155_s17 + $0x20] sm:$0xff]  ;;  %v436_v15 = vpack.c.bf16 %v414_v13, %v413_v12  ;;  %v400_v16 = vld [vmem:[%s3155_s17 + $0x28] sm:$0xff]  ;;  %2517 = vmatprep.mubr.msk.bf16.mxu1 %vm451_vm2, %v435_v10  ;;  %p2870_p12 = scmp.ne.s32.totalorder %s4675_s20, %s2869_s11  ;;  %p2877_p2 = scmp.lt.s32.totalorder %s2875_s15, %s2869_s11 }
  0x21   : > { %371 = vst.msk [vmem:[#allocation2 + $0xf0] sm:$0xff] %vm339_vm1, %v2977_v2  ;;  %372 = vst.msk [vmem:[#allocation2 + $0xf8] sm:$0xff] %vm339_vm1, %v2977_v2  ;;  %v415_v17 = vld [vmem:[%s3155_s17 + $0xa0] sm:$0xff]  ;;  %v416_v18 = vld [vmem:[%s3155_s17 + $0xa8] sm:$0xff]  ;;  %2502 = vmatmul.mubr.msk.bf16.vlgmr.msra.gmra.mxu0 %vm451_vm2, %v428_v11  ;;  %v429_v19 = vpack.c.bf16 %v400_v16, %v399_v14 }
  0x22   : > { %374 = vst.msk [vmem:[#allocation2 + $0x108] sm:$0xff] %vm339_vm1, %v2977_v2  ;;  %375 = vst.msk [vmem:[#allocation2 + $0x110] sm:$0xff] %vm339_vm1, %v2977_v2  ;;  %v437_v20 = vpack.c.bf16 %v416_v18, %v415_v17  ;;  %2518 = vmatmul.mubr.msk.bf16.vlgmr.msra.gmra.mxu1 %vm451_vm2, %v436_v15  ;;  %v401_v21 = vld [vmem:[%s3155_s17 + $0x30] sm:$0xff]  ;;  %v402_v22 = vld [vmem:[%s3155_s17 + $0x38] sm:$0xff]  ;;  %p2871_p13 = pnand %p2870_p12, %p3057_p4  ;;  %p2878_p3 = por %p2877_p2, %p2876_p1 }
  0x23   : > { %377 = vst.msk [vmem:[#allocation2 + $0x120] sm:$0xff] %vm339_vm1, %v2977_v2  ;;  %378 = vst.msk [vmem:[#allocation2 + $0x128] sm:$0xff] %vm339_vm1, %v2977_v2  ;;  %v417_v23 = vld [vmem:[%s3155_s17 + $0xb0] sm:$0xff]  ;;  %2505 = vmatprep.mubr.msk.bf16.mxu0 %vm451_vm2, %v429_v19  ;;  %v418_v24 = vld [vmem:[%s3155_s17 + $0xb8] sm:$0xff]  ;;  %v430_v29 = vpack.c.bf16 %v402_v22, %v401_v21 }
  0x24   : > { %380 = vst.msk [vmem:[#allocation2 + $0x138] sm:$0xff] %vm339_vm1, %v2977_v2  ;;  %381 = vst.msk [vmem:[#allocation2 + $0x140] sm:$0xff] %vm339_vm1, %v2977_v2  ;;  %2521 = vmatprep.mubr.msk.bf16.mxu1 %vm451_vm2, %v437_v20  ;;  %v403_v25 = vld [vmem:[%s3155_s17 + $0x40] sm:$0xff]  ;;  %v404_v26 = vld [vmem:[%s3155_s17 + $0x48] sm:$0xff]  ;;  %v438_v30 = vpack.c.bf16 %v418_v24, %v417_v23  ;;  %p2872_p0 = pneg %p2871_p13 }
  0x25   : > { %383 = vst.msk [vmem:[#allocation2 + $0x150] sm:$0xff] %vm339_vm1, %v2977_v2  ;;  %384 = vst.msk [vmem:[#allocation2 + $0x158] sm:$0xff] %vm339_vm1, %v2977_v2  ;;  %v419_v27 = vld [vmem:[%s3155_s17 + $0xc0] sm:$0xff]  ;;  %v420_v28 = vld [vmem:[%s3155_s17 + $0xc8] sm:$0xff]  ;;  %v431_v31 = vpack.c.bf16 %v404_v26, %v403_v25 }
  0x26   : > { %386 = vst.msk [vmem:[#allocation2 + $0x168] sm:$0xff] %vm339_vm1, %v2977_v2  ;;  %387 = vst.msk [vmem:[#allocation2 + $0x170] sm:$0xff] %vm339_vm1, %v2977_v2  ;;  %v439_v32 = vpack.c.bf16 %v420_v28, %v419_v27  ;;  %v405_v33 = vld [vmem:[%s3155_s17 + $0x50] sm:$0xff]  ;;  %v406_v34 = vld [vmem:[%s3155_s17 + $0x58] sm:$0xff]  ;;  %p2879_p5 = pnand %p2878_p3, %p2872_p0 }
  0x27   : > { %389 = vst.msk [vmem:[#allocation2 + $0x180] sm:$0xff] %vm339_vm1, %v2977_v2  ;;  %390 = vst.msk [vmem:[#allocation2 + $0x188] sm:$0xff] %vm339_vm1, %v2977_v2  ;;  %v421_v35 = vld [vmem:[%s3155_s17 + $0xd0] sm:$0xff]  ;;  %v422_v36 = vld [vmem:[%s3155_s17 + $0xd8] sm:$0xff]  ;;  %v432_v41 = vpack.c.bf16 %v406_v34, %v405_v33 }
  0x28   : > { %392 = vst.msk [vmem:[#allocation2 + $0x198] sm:$0xff] %vm339_vm1, %v2977_v2  ;;  %393 = vst.msk [vmem:[#allocation2 + $0x1a0] sm:$0xff] %vm339_vm1, %v2977_v2  ;;  %v407_v37 = vld [vmem:[%s3155_s17 + $0x60] sm:$0xff]  ;;  %v408_v38 = vld [vmem:[%s3155_s17 + $0x68] sm:$0xff]  ;;  %v440_v42 = vpack.c.bf16 %v422_v36, %v421_v35 }
  0x29   : > { %2506 = vmatmul.mubr.msk.bf16.gmra.mxu0 %vm451_vm2, %v430_v29  ;;  %v423_v39 = vld [vmem:[%s3155_s17 + $0xe0] sm:$0xff]  ;;  %v424_v40 = vld [vmem:[%s3155_s17 + $0xe8] sm:$0xff]  ;;  %v433_v43 = vpack.c.bf16 %v408_v38, %v407_v37  ;;  %v409_v45 = vld [vmem:[%s3155_s17 + $0x70] sm:$0xff]  ;;  %349 = vst.msk [vmem:[#allocation2 + $0x40] sm:$0x3] %vm342_vm3, %v2977_v2 }
  0x2a   : > { %2522 = vmatmul.mubr.msk.bf16.gmra.mxu1 %vm451_vm2, %v438_v30  ;;  %2509 = vmatprep.mubr.msk.bf16.mxu0 %vm451_vm2, %v431_v31  ;;  %v441_v44 = vpack.c.bf16 %v424_v40, %v423_v39  ;;  %v410_v46 = vld [vmem:[%s3155_s17 + $0x78] sm:$0xff]  ;;  %v425_v47 = vld [vmem:[%s3155_s17 + $0xf0] sm:$0xff]  ;;  %343 = vst.msk [vmem:[#allocation2 + $0x10] sm:$0x3] %vm342_vm3, %v2977_v2  ;;  %346 = vst.msk [vmem:[#allocation2 + $0x28] sm:$0x3] %vm342_vm3, %v2977_v2 }
  0x2b   : > { %2525 = vmatprep.mubr.msk.bf16.mxu1 %vm451_vm2, %v439_v32  ;;  %v426_v48 = vld [vmem:[%s3155_s17 + $0xf8] sm:$0xff]  ;;  %v434_v49 = vpack.c.bf16 %v410_v46, %v409_v45  ;;  %352 = vst.msk [vmem:[#allocation2 + $0x58] sm:$0x3] %vm342_vm3, %v2977_v2  ;;  %355 = vst.msk [vmem:[#allocation2 + $0x70] sm:$0x3] %vm342_vm3, %v2977_v2 }
  0x2c   : > { %v442_v50 = vpack.c.bf16 %v426_v48, %v425_v47  ;;  %358 = vst.msk [vmem:[#allocation2 + $0x88] sm:$0x3] %vm342_vm3, %v2977_v2  ;;  %361 = vst.msk [vmem:[#allocation2 + $0xa0] sm:$0x3] %vm342_vm3, %v2977_v2 }
  0x2d   : > { %364 = vst.msk [vmem:[#allocation2 + $0xb8] sm:$0x3] %vm342_vm3, %v2977_v2  ;;  %367 = vst.msk [vmem:[#allocation2 + $0xd0] sm:$0x3] %vm342_vm3, %v2977_v2 }
  0x2e   : > { %370 = vst.msk [vmem:[#allocation2 + $0xe8] sm:$0x3] %vm342_vm3, %v2977_v2  ;;  %373 = vst.msk [vmem:[#allocation2 + $0x100] sm:$0x3] %vm342_vm3, %v2977_v2 }
  0x2f   : > { %376 = vst.msk [vmem:[#allocation2 + $0x118] sm:$0x3] %vm342_vm3, %v2977_v2  ;;  %379 = vst.msk [vmem:[#allocation2 + $0x130] sm:$0x3] %vm342_vm3, %v2977_v2 }
  0x30   : > { %382 = vst.msk [vmem:[#allocation2 + $0x148] sm:$0x3] %vm342_vm3, %v2977_v2  ;;  %385 = vst.msk [vmem:[#allocation2 + $0x160] sm:$0x3] %vm342_vm3, %v2977_v2 }
  0x31   : > { %2510 = vmatmul.mubr.msk.bf16.gmra.mxu0 %vm451_vm2, %v432_v41  ;;  %388 = vst.msk [vmem:[#allocation2 + $0x178] sm:$0x3] %vm342_vm3, %v2977_v2  ;;  %391 = vst.msk [vmem:[#allocation2 + $0x190] sm:$0x3] %vm342_vm3, %v2977_v2 }
  0x32   : > { %2526 = vmatmul.mubr.msk.bf16.gmra.mxu1 %vm451_vm2, %v440_v42  ;;  %2513 = vmatprep.mubr.msk.bf16.mxu0 %vm451_vm2, %v433_v43  ;;  %394 = vst.msk [vmem:[#allocation2 + $0x1a8] sm:$0x3] %vm342_vm3, %v2977_v2  ;;  %4807 = vst [vmem:[#allocation9_spill] sm:$0xff] %v3244_v51  ;;  %v957_v42 = vlaneseq }
  0x33   : > { %2529 = vmatprep.mubr.msk.bf16.mxu1 %vm451_vm2, %v441_v44 }
  0x39   : > { %2514 = vmatmul.mubr.msk.bf16.gmra.mxu0 %vm451_vm2, %v434_v49 }
  0x3a   : > { %2530 = vmatmul.mubr.msk.bf16.gmra.mxu1 %vm451_vm2, %v442_v50 }
  0xe1   : > { %v2503_v52 = vpop.f32.mrf.mxu0 }
  0xe2   : > { %v3247_v53 = vadd.f32 %v2503_v52, %v3244_v51  ;;  %v2519_v54 = vpop.f32.mrf.mxu1  ;;  %v958_v52 = vshrl.u32 %v957_v42, 7 }
  0xe3   : > { %v3250_v55 = vadd.f32 %v2519_v54, %v3244_v51  ;;  %v538_v56 = vpop.f32.mrf.mxu0 }
  0xe4   : > { %v2411_v57 = vmul.f32 -1.442695, %v3247_v53  ;;  %v3254_v58 = vadd.f32 %v3244_v51, %v538_v56  ;;  %v602_v59 = vpop.f32.mrf.mxu1 }
  0xe5   : > { %v2427_v60 = vmul.f32 -1.442695, %v3250_v55  ;;  %v3258_v61 = vadd.f32 %v3244_v51, %v602_v59  ;;  %v2504_v62 = vpop.f32.mrf.mxu0 }
  0xe6   : > { %2600 = vpow2.f32 %v2411_v57  ;;  %v2409_v63 = vmul.f32 -1.442695, %v3254_v58  ;;  %v3262_v0 = vadd.f32 %v2504_v62, %v3244_v51  ;;  %v2520_v1 = vpop.f32.mrf.mxu1 }
  0xe7   : > { %2602 = vpow2.f32 %v2427_v60  ;;  %v2425_v2 = vmul.f32 -1.442695, %v3258_v61  ;;  %v3266_v3 = vadd.f32 %v2520_v1, %v3244_v51  ;;  %v541_v4 = vpop.f32.mrf.mxu0 }
  0xe8   : > { %2604 = vpow2.f32 %v2409_v63  ;;  %v2412_v5 = vmul.f32 -1.442695, %v3262_v0  ;;  %v3270_v6 = vadd.f32 %v3244_v51, %v541_v4  ;;  %v605_v7 = vpop.f32.mrf.mxu1  ;;  %v3312_v4 = vsub.s32 0, %v958_v52 }
  0xe9   : > { %2606 = vpow2.f32 %v2425_v2  ;;  %v2428_v8 = vmul.f32 -1.442695, %v3266_v3  ;;  %v3274_v9 = vadd.f32 %v3244_v51, %v605_v7  ;;  %v2507_v10 = vpop.f32.mrf.mxu0 }
  0xea   : > { %2608 = vpow2.f32 %v2412_v5  ;;  %v2410_v11 = vmul.f32 -1.442695, %v3270_v6  ;;  %v3278_v12 = vadd.f32 %v2507_v10, %v3244_v51  ;;  %v2523_v13 = vpop.f32.mrf.mxu1  ;;  %v3314_v5 = vsub.s32 1, %v958_v52 }
  0xeb   : > { %2610 = vpow2.f32 %v2428_v8  ;;  %v2426_v14 = vmul.f32 -1.442695, %v3274_v9  ;;  %v3282_v15 = vadd.f32 %v2523_v13, %v3244_v51  ;;  %v554_v16 = vpop.f32.mrf.mxu0 }
  0xec   : > { %2612 = vpow2.f32 %v2410_v11  ;;  %v2415_v17 = vmul.f32 -1.442695, %v3278_v12  ;;  %v3286_v18 = vadd.f32 %v3244_v51, %v554_v16  ;;  %v618_v19 = vpop.f32.mrf.mxu1  ;;  %v922_v11 = vld [vmem:[%s4762_s3] sm:$0x7] }
  0xed   : > { %2614 = vpow2.f32 %v2426_v14  ;;  %v2431_v20 = vmul.f32 -1.442695, %v3282_v15  ;;  %v3290_v21 = vadd.f32 %v3244_v51, %v618_v19  ;;  %v2508_v22 = vpop.f32.mrf.mxu0  ;;  %v3331_v19 = vrot.slane %v922_v11, %v3314_v5 }
  0xee   : > { %2616 = vpow2.f32 %v2415_v17  ;;  %v2413_v23 = vmul.f32 -1.442695, %v3286_v18  ;;  %v3294_v24 = vadd.f32 %v2508_v22, %v3244_v51  ;;  %v2524_v25 = vpop.f32.mrf.mxu1  ;;  %v3328_v17 = vrot.slane %v922_v11, %v3312_v4 }
  0xef   : > { %2618 = vpow2.f32 %v2431_v20  ;;  %v2429_v26 = vmul.f32 -1.442695, %v3290_v21  ;;  %v3298_v27 = vadd.f32 %v2524_v25, %v3244_v51  ;;  %v557_v28 = vpop.f32.mrf.mxu0  ;;  %v925_v25 = vld [vmem:[#allocation2] sm:$0xff] }
  0xf0   : > { %2620 = vpow2.f32 %v2413_v23  ;;  %v2416_v29 = vmul.f32 -1.442695, %v3294_v24  ;;  %v3302_v30 = vadd.f32 %v3244_v51, %v557_v28  ;;  %v621_v31 = vpop.f32.mrf.mxu1  ;;  %v3337_v28 = vsub.s32 2, %v958_v52 }
  0xf1   : > { %2622 = vpow2.f32 %v2429_v26  ;;  %v2432_v32 = vmul.f32 -1.442695, %v3298_v27  ;;  %v3306_v33 = vadd.f32 %v3244_v51, %v621_v31  ;;  %v3310_v56 = vpop.f32.mrf.mxu0  ;;  %v1025_v26 = vld [vmem:[#allocation2 + $0x1] sm:$0xff] }
  0xf2   : > { %2624 = vpow2.f32 %v2416_v29  ;;  %v2414_v34 = vmul.f32 -1.442695, %v3302_v30  ;;  %v3316_v7 = vpop.f32.mrf.mxu1 }
  0xf3   : > { %v2601_v35 = vpop.eup %2600  ;;  %2626 = vpow2.f32 %v2432_v32  ;;  %v2430_v36 = vmul.f32 -1.442695, %v3306_v33  ;;  %v3318_v8 = vpop.f32.mrf.mxu0 }
  0xf4   : > { %v2603_v37 = vpop.eup %2602  ;;  %v763_v38 = vadd.f32 1.0, %v2601_v35  ;;  %2628 = vpow2.f32 %v2414_v34  ;;  %v3333_v20 = vpop.f32.mrf.mxu1 }
  0xf5   : > { %v2605_v39 = vpop.eup %2604  ;;  %v779_v40 = vadd.f32 1.0, %v2603_v37  ;;  %2630 = vpow2.f32 %v2430_v36  ;;  %v3335_v22 = vpop.f32.mrf.mxu0  ;;  %v961_v37 = vmul.f32 %v3328_v17, %v925_v25 }
  0xf6   : > { %v2607_v41 = vpop.eup %2606  ;;  %2632 = vrcp.f32 %v763_v38  ;;  %v761_v43 = vadd.f32 1.0, %v2605_v39  ;;  %v1061_v38 = vmul.f32 %v3331_v19, %v1025_v26  ;;  %v3345_v39 = vpop.f32.mrf.mxu1  ;;  %v3383_v26 = vadd.f32 %v3310_v56, %v3244_v51 }
  0xf7   : > { %v2609_v44 = vpop.eup %2608  ;;  %2634 = vrcp.f32 %v779_v40  ;;  %v777_v45 = vadd.f32 1.0, %v2607_v41  ;;  %v3347_v40 = vpop.f32.mrf.mxu0 }
  0xf8   : > { %v2611_v46 = vpop.eup %2610  ;;  %2636 = vrcp.f32 %v761_v43  ;;  %v764_v47 = vadd.f32 1.0, %v2609_v44  ;;  %v1125_v43 = vld [vmem:[#allocation2 + $0x2] sm:$0xff]  ;;  %v1093_v52 = vadd.f32 %v1061_v38, %v961_v37  ;;  %4809 = vst [vmem:[#allocation11_spill] sm:$0xff] %v3383_v26 }
  0xf9   : > { %v2613_v48 = vpop.eup %2612  ;;  %2638 = vrcp.f32 %v777_v45  ;;  %v780_v49 = vadd.f32 1.0, %v2611_v46  ;;  %v926_v45 = vld [vmem:[#allocation2 + $0x8] sm:$0xff] }
  0xfa   : > { %v2615_v50 = vpop.eup %2614  ;;  %2640 = vrcp.f32 %v764_v47  ;;  %v762_v54 = vadd.f32 1.0, %v2613_v48  ;;  %v1026_v48 = vld [vmem:[#allocation2 + $0x9] sm:$0xff] }
  0xfb   : > { %v2617_v57 = vpop.eup %2616  ;;  %2642 = vrcp.f32 %v780_v49  ;;  %v778_v59 = vadd.f32 1.0, %v2615_v50 }
  0xfc   : > { %v2619_v60 = vpop.eup %2618  ;;  %2644 = vrcp.f32 %v762_v54  ;;  %v767_v62 = vadd.f32 1.0, %v2617_v57  ;;  %v637_v57 = vpop.f32.mrf.mxu1 }
  0xfd   : > { %v2621_v63 = vpop.eup %2620  ;;  %2646 = vrcp.f32 %v778_v59  ;;  %v783_v1 = vadd.f32 1.0, %v2619_v60  ;;  %v3372_v60 = vld [vmem:[%s4762_s3 + $0x8] sm:$0x7] }
  0xfe   : > { %v2623_v2 = vpop.eup %2622  ;;  %2648 = vrcp.f32 %v767_v62  ;;  %v765_v54 = vadd.f32 1.0, %v2621_v63  ;;  %v962_v62 = vmul.f32 %v3328_v17, %v926_v45 }
  0xff   : > { %v2625_v10 = vpop.eup %2624  ;;  %2650 = vrcp.f32 %v783_v1 }
 0x100   : > { %v2627_v13 = vpop.eup %2626  ;;  %v768_v25 = vadd.f32 1.0, %v2625_v10  ;;  %v1126_v10 = vld [vmem:[#allocation2 + $0xa] sm:$0xff]  ;;  %2652 = vrcp.f32 %v765_v54 }
 0x101   : > { %v3323_v14 = vpop.eup %2628 }
 0x102   : > { %v3325_v16 = vpop.eup %2630  ;;  %v766_v56 = vadd.f32 1.0, %v3323_v14 }
 0x103   : > { %v2633_v23 = vpop.eup %2632 }
 0x104   : > { %v2635_v29 = vpop.eup %2634  ;;  %v859_v31 = vmul.f32 %v2633_v23, %v3247_v53  ;;  %v3352_v53 = vld [vmem:[%s4762_s3 + $0x4] sm:$0x7] }
 0x105   : > { %v2637_v32 = vpop.eup %2636  ;;  %v875_v34 = vmul.f32 %v2635_v29, %v3250_v55  ;;  %v3356_v55 = vrot.slane %v922_v11, %v3337_v28  ;;  %v3365_v50 = vrot.slane %v3352_v53, %v3312_v4  ;;  %v781_v11 = vadd.f32 1.0, %v2623_v2 }
 0x106   : > { %v2639_v35 = vpop.eup %2638  ;;  %892 = vst.msk [vmem:[#allocation2 + $0x31] sm:$0xff] %vm339_vm1, %v859_v31  ;;  %v857_v36 = vmul.f32 %v2637_v32, %v3254_v58  ;;  %v3387_v29 = vrot.slane %v3352_v53, %v3314_v5  ;;  %v784_v2 = vadd.f32 1.0, %v2627_v13  ;;  %v3393_v31 = vadd.f32 %v3316_v7, %v3244_v51 }
 0x107   : > { %v2641_v41 = vpop.eup %2640  ;;  %908 = vst.msk [vmem:[#allocation2 + $0xf1] sm:$0xff] %vm339_vm1, %v875_v34  ;;  %v873_v58 = vmul.f32 %v2639_v35, %v3258_v61  ;;  %4808 = vst [vmem:[#allocation10_spill] sm:$0xff] %v3365_v50  ;;  %v3403_v32 = vadd.f32 %v3244_v51, %v3318_v8  ;;  %2654 = vrcp.f32 %v781_v11  ;;  %v782_v7 = vadd.f32 1.0, %v3325_v16 }
 0x108   : > { %v2643_v42 = vpop.eup %2642  ;;  %890 = vst.msk [vmem:[#allocation2 + $0x19] sm:$0xff] %vm339_vm1, %v857_v36  ;;  %v860_v44 = vmul.f32 %v2641_v41, %v3262_v0  ;;  %v2515_v0 = vpop.f32.mrf.mxu0  ;;  %4810 = vst [vmem:[#allocation12_spill] sm:$0xff] %v3387_v29  ;;  %v3413_v34 = vadd.f32 %v3335_v22, %v3244_v51  ;;  %2656 = vrcp.f32 %v768_v25  ;;  %v2419_v8 = vmul.f32 -1.442695, %v3383_v26 }
 0x109   : > { %v2645_v46 = vpop.eup %2644  ;;  %906 = vst.msk [vmem:[#allocation2 + $0xd9] sm:$0xff] %vm339_vm1, %v873_v58  ;;  %v876_v47 = vmul.f32 %v2643_v42, %v3266_v3  ;;  %v1161_v3 = vmul.f32 %v3356_v55, %v1125_v43  ;;  %4811 = vst [vmem:[#allocation13_spill] sm:$0xff] %v3393_v31  ;;  %v1162_v37 = vmul.f32 %v3356_v55, %v1126_v10  ;;  %2658 = vrcp.f32 %v784_v2 }
 0x10a   : > { %v2647_v49 = vpop.eup %2646  ;;  %893 = vst.msk [vmem:[#allocation2 + $0x39] sm:$0xff] %vm339_vm1, %v860_v44  ;;  %v858_v61 = vmul.f32 %v2645_v46, %v3270_v6  ;;  %v1062_v6 = vmul.f32 %v3331_v19, %v1026_v48  ;;  %4812 = vst [vmem:[#allocation14_spill] sm:$0xff] %v3403_v32  ;;  %v586_v13 = vpop.f32.mrf.mxu0  ;;  %v2435_v38 = vmul.f32 -1.442695, %v3393_v31  ;;  %v3420_v16 = vadd.f32 %v3345_v39, %v3244_v51 }
 0x10b   : > { %v2649_v59 = vpop.eup %2648  ;;  %909 = vst.msk [vmem:[#allocation2 + $0xf9] sm:$0xff] %vm339_vm1, %v876_v47  ;;  %v874_v1 = vmul.f32 %v2647_v49, %v3274_v9  ;;  %4814 = vst [vmem:[#allocation16_spill] sm:$0xff] %v3413_v34  ;;  %v1193_v14 = vadd.f32 %v1161_v3, %v1093_v52  ;;  %2660 = vrcp.f32 %v766_v56  ;;  %v3425_v22 = vadd.f32 %v3244_v51, %v3347_v40 }
 0x10c   : > { %v2651_v23 = vpop.eup %2650  ;;  %891 = vst.msk [vmem:[#allocation2 + $0x21] sm:$0xff] %vm339_vm1, %v858_v61  ;;  %v863_v63 = vmul.f32 %v2649_v59, %v3278_v12  ;;  %v3397_v12 = vrot.slane %v3372_v60, %v3312_v4  ;;  %v3409_v4 = vadd.f32 %v3244_v51, %v3333_v20  ;;  %v1094_v35 = vadd.f32 %v1062_v6, %v962_v62  ;;  %v2516_v42 = vpop.f32.mrf.mxu0 }
 0x10d   : > { %907 = vst.msk [vmem:[#allocation2 + $0xe1] sm:$0xff] %vm339_vm1, %v874_v1  ;;  %v879_v9 = vmul.f32 %v2651_v23, %v3282_v15  ;;  %v2531_v15 = vpop.f32.mrf.mxu1  ;;  %4815 = vst [vmem:[#allocation17_spill] sm:$0xff] %v3420_v16  ;;  %v2417_v20 = vmul.f32 -1.442695, %v3403_v32  ;;  %v3428_v41 = vadd.f32 %v3244_v51, %v637_v57  ;;  %2662 = vrcp.f32 %v782_v7  ;;  %v929_v57 = vld [vmem:[#allocation2 + $0x30] sm:$0xff] }
 0x10e   : > { %896 = vst.msk [vmem:[#allocation2 + $0x61] sm:$0xff] %vm339_vm1, %v863_v63  ;;  %4813 = vst [vmem:[#allocation15_spill] sm:$0xff] %v3409_v4  ;;  %v2433_v43 = vmul.f32 -1.442695, %v3409_v4  ;;  %v2420_v44 = vmul.f32 -1.442695, %v3413_v34  ;;  %v3433_v39 = vadd.f32 %v2515_v0, %v3244_v51  ;;  %2664 = vpow2.f32 %v2419_v8 }
 0x10f   : > { %912 = vst.msk [vmem:[#allocation2 + $0x121] sm:$0xff] %vm339_vm1, %v879_v9  ;;  %v927_v36 = vld [vmem:[#allocation2 + $0x18] sm:$0xff]  ;;  %4816 = vst [vmem:[#allocation18_spill] sm:$0xff] %v3425_v22  ;;  %v650_v58 = vpop.f32.mrf.mxu1  ;;  %v3437_v46 = vadd.f32 %v2531_v15, %v3244_v51  ;;  %v3440_v40 = vadd.f32 %v3244_v51, %v586_v13  ;;  %2666 = vpow2.f32 %v2435_v38  ;;  %v2436_v47 = vmul.f32 -1.442695, %v3420_v16  ;;  %v945_v1 = vld [vmem:[#allocation2 + $0xf0] sm:$0xff]  ;;  %v3481_v13 = vpop.eup %2652 }
 0x110   : > { %4817 = vst [vmem:[#allocation19_spill] sm:$0xff] %v3428_v41  ;;  %4818 = vst [vmem:[#allocation20_spill] sm:$0xff] %v3433_v39  ;;  %v1261_v45 = vmul.f32 %v3365_v50, %v927_v36  ;;  %v3444_v48 = vadd.f32 %v3244_v51, %v650_v58  ;;  %v3447_v49 = vadd.f32 %v2516_v42, %v3244_v51  ;;  %2668 = vpow2.f32 %v2417_v20  ;;  %v1029_v0 = vld [vmem:[#allocation2 + $0x31] sm:$0xff]  ;;  %v1027_v59 = vld [vmem:[#allocation2 + $0x19] sm:$0xff] }
 0x111   : > { %4819 = vst [vmem:[#allocation21_spill] sm:$0xff] %v3437_v46  ;;  %4820 = vst [vmem:[#allocation22_spill] sm:$0xff] %v3440_v40  ;;  %v3451_v52 = vrot.slane %v3372_v60, %v3314_v5  ;;  %v2418_v61 = vmul.f32 -1.442695, %v3425_v22  ;;  %v2434_v54 = vmul.f32 -1.442695, %v3428_v41  ;;  %v3457_v3 = vrot.slane %v3352_v53, %v3337_v28 }
 0x112   : > { %4821 = vst [vmem:[#allocation23_spill] sm:$0xff] %v3444_v48  ;;  %4822 = vst [vmem:[#allocation24_spill] sm:$0xff] %v3447_v49  ;;  %v3461_v62 = vrot.slane %v3372_v60, %v3337_v28  ;;  %2670 = vpow2.f32 %v2433_v43  ;;  %v3464_v5 = vmul.f32 -1.442695, %v3433_v39  ;;  %v1045_v11 = vld [vmem:[#allocation2 + $0xf1] sm:$0xff]  ;;  %v1293_v23 = vadd.f32 %v1261_v45, %v1193_v14  ;;  %v1043_v25 = vld [vmem:[#allocation2 + $0xd9] sm:$0xff] }
 0x113   : > { %2672 = vpow2.f32 %v2420_v44  ;;  %v3467_v6 = vmul.f32 -1.442695, %v3437_v46  ;;  %v3470_v63 = vmul.f32 -1.442695, %v3440_v40  ;;  %v943_v53 = vld [vmem:[#allocation2 + $0xd8] sm:$0xff]  ;;  %v1194_v9 = vadd.f32 %v1162_v37, %v1094_v35  ;;  %v928_v15 = vld [vmem:[#allocation2 + $0x20] sm:$0xff] }
 0x114   : > { %4823 = vst [vmem:[#allocation25_spill] sm:$0xff] %v3461_v62  ;;  %4824 = vst [vmem:[#allocation26_spill] sm:$0xff] %v3464_v5  ;;  %2674 = vpow2.f32 %v2436_v47  ;;  %v3473_v28 = vmul.f32 -1.442695, %v3444_v48  ;;  %v3476_v60 = vmul.f32 -1.442695, %v3447_v49  ;;  %v965_v2 = vmul.f32 %v3328_v17, %v929_v57  ;;  %v3486_v37 = vpop.eup %2654 }
 0x115   : > { %4825 = vst [vmem:[#allocation27_spill] sm:$0xff] %v3467_v6  ;;  %4826 = vst [vmem:[#allocation28_spill] sm:$0xff] %v3470_v63  ;;  %v1065_v10 = vmul.f32 %v3331_v19, %v1029_v0  ;;  %v1361_v56 = vmul.f32 %v3387_v29, %v1027_v59  ;;  %2676 = vpow2.f32 %v2418_v61  ;;  %v981_v7 = vmul.f32 %v3328_v17, %v945_v1  ;;  %v1127_v8 = vld [vmem:[#allocation2 + $0x1a] sm:$0xff]  ;;  %v3491_v44 = vpop.eup %2656  ;;  %v1129_v49 = vld [vmem:[#allocation2 + $0x32] sm:$0xff] }
 0x116   : > { %4827 = vst [vmem:[#allocation29_spill] sm:$0xff] %v3473_v28  ;;  %4828 = vst [vmem:[#allocation30_spill] sm:$0xff] %v3476_v60  ;;  %v1081_v14 = vmul.f32 %v3331_v19, %v1045_v11  ;;  %v963_v35 = vmul.f32 %v3328_v17, %v927_v36  ;;  %2678 = vpow2.f32 %v2434_v54  ;;  %v1063_v38 = vmul.f32 %v3331_v19, %v1027_v59  ;;  %v1028_v43 = vld [vmem:[#allocation2 + $0x21] sm:$0xff]  ;;  %v930_v61 = vld [vmem:[#allocation2 + $0x38] sm:$0xff]  ;;  %v3501_v59 = vpop.eup %2658 }
 0x117   : > { %v1393_v20 = vadd.f32 %v1361_v56, %v1293_v23  ;;  %v979_v58 = vmul.f32 %v3328_v17, %v943_v53  ;;  %v1079_v42 = vmul.f32 %v3331_v19, %v1043_v25  ;;  %v3494_v45 = vmul.f32 %v3365_v50, %v929_v57  ;;  %v1030_v56 = vld [vmem:[#allocation2 + $0x39] sm:$0xff]  ;;  %v1128_v48 = vld [vmem:[#allocation2 + $0x22] sm:$0xff] }
 0x118   : > { %v3497_v47 = vmul.f32 %v3387_v29, %v1029_v0  ;;  %v1562_v36 = vmul.f32 %v3397_v12, %v929_v57  ;;  %v1262_v54 = vmul.f32 %v3365_v50, %v928_v15  ;;  %v1097_v23 = vadd.f32 %v1065_v10, %v965_v2  ;;  %v3508_v46 = vpop.eup %2660  ;;  %v1130_v60 = vld [vmem:[#allocation2 + $0x3a] sm:$0xff] }
 0x119   : > { %v1662_v53 = vmul.f32 %v3451_v52, %v1029_v0  ;;  %v3505_v25 = vmul.f32 %v3365_v50, %v945_v1  ;;  %v1461_v40 = vmul.f32 %v3457_v3, %v1127_v8  ;;  %v3510_v39 = vadd.f32 %v1081_v14, %v981_v7  ;;  %v944_v22 = vld [vmem:[#allocation2 + $0xe0] sm:$0xff] }
 0x11a   : > { %v3513_v57 = vmul.f32 %v3387_v29, %v1045_v11  ;;  %v1294_v41 = vadd.f32 %v1262_v54, %v1194_v9  ;;  %v1362_v2 = vmul.f32 %v3387_v29, %v1028_v43  ;;  %v3516_v0 = vpop.eup %2662  ;;  %v1095_v1 = vadd.f32 %v1063_v38, %v963_v35  ;;  %v1044_v9 = vld [vmem:[#allocation2 + $0xe1] sm:$0xff] }
 0x11b   : > { %v1111_v10 = vadd.f32 %v1079_v42, %v979_v58  ;;  %v966_v28 = vmul.f32 %v3328_v17, %v930_v61  ;;  %v1493_v63 = vadd.f32 %v1461_v40, %v1393_v20  ;;  %v3519_v6 = vpop.eup %2664  ;;  %v1066_v5 = vmul.f32 %v3331_v19, %v1030_v56  ;;  %v1143_v34 = vld [vmem:[#allocation2 + $0xda] sm:$0xff] }
 0x11c   : > { %v1165_v7 = vmul.f32 %v3356_v55, %v1129_v49  ;;  %v1394_v14 = vadd.f32 %v1362_v2, %v1294_v41  ;;  %v1462_v11 = vmul.f32 %v3457_v3, %v1128_v48  ;;  %v3524_v54 = vpop.eup %2666  ;;  %v1166_v16 = vmul.f32 %v3356_v55, %v1130_v60 }
 0x11d   : > { %v3528_v35 = vmul.f32 %v3365_v50, %v930_v61  ;;  %v3531_v40 = vmul.f32 %v3387_v29, %v1030_v56  ;;  %v1594_v38 = vadd.f32 %v1562_v36, %v1493_v63  ;;  %v3533_v20 = vpop.eup %2668  ;;  %v1563_v58 = vmul.f32 %v3397_v12, %v930_v61 }
 0x11e   : > { %4829 = vst [vmem:[#allocation31_spill] sm:$0xff] %v3533_v20  ;;  %v964_v41 = vmul.f32 %v3328_v17, %v928_v15  ;;  %v1064_v42 = vmul.f32 %v3331_v19, %v1028_v43  ;;  %v1494_v2 = vadd.f32 %v1462_v11, %v1394_v14  ;;  %v1762_v32 = vmul.f32 %v3461_v62, %v1129_v49  ;;  %v946_v20 = vld [vmem:[#allocation2 + $0xf8] sm:$0xff]  ;;  %v3550_v11 = vld [vmem:[%s4763_s4] ss:$0 sm:$0xff] }
 0x11f   : > { %v3538_v4 = vpop.eup %2670  ;;  %v1694_v31 = vadd.f32 %v1662_v53, %v1594_v38  ;;  %v980_v26 = vmul.f32 %v3328_v17, %v944_v22  ;;  %v1080_v51 = vmul.f32 %v3331_v19, %v1044_v9  ;;  %v1098_v36 = vadd.f32 %v1066_v5, %v966_v28  ;;  %v1046_v15 = vld [vmem:[#allocation2 + $0xf9] sm:$0xff] }
 0x120   : > { %4830 = vst [vmem:[#allocation32_spill] sm:$0xff] %v3538_v4  ;;  %v3543_v63 = vpop.eup %2672  ;;  %v1663_v61 = vmul.f32 %v3451_v52, %v1030_v56  ;;  %v1163_v43 = vmul.f32 %v3356_v55, %v1127_v8  ;;  %v1595_v14 = vadd.f32 %v1563_v58, %v1494_v2  ;;  %v3555_v22 = vmul.f32 %v3457_v3, %v1129_v49 }
 0x121   : > { %4831 = vst [vmem:[#allocation33_spill] sm:$0xff] %v3543_v63  ;;  %v3552_v53 = vpop.eup %2674  ;;  %v3558_v9 = vmul.f32 %v3457_v3, %v1130_v60  ;;  %v1794_v5 = vadd.f32 %v1762_v32, %v1694_v31  ;;  %v1179_v28 = vmul.f32 %v3356_v55, %v1143_v34  ;;  %v3563_v8 = vadd.f32 %v1165_v7, %v1097_v23  ;;  %v1144_v63 = vld [vmem:[#allocation2 + $0xe2] sm:$0xff] }
 0x122   : > { %4832 = vst [vmem:[#allocation34_spill] sm:$0xff] %v3552_v53  ;;  %v3561_v56 = vpop.eup %2676  ;;  %v1763_v38 = vmul.f32 %v3461_v62, %v1130_v60  ;;  %v1096_v58 = vadd.f32 %v1064_v42, %v964_v41  ;;  %v1695_v2 = vadd.f32 %v1663_v61, %v1595_v14  ;;  %v982_v49 = vmul.f32 %v3328_v17, %v946_v20  ;;  %v1145_v60 = vld [vmem:[#allocation2 + $0xf2] sm:$0xff]  ;;  %v1146_v62 = vld [vmem:[#allocation2 + $0xfa] sm:$0xff] }
 0x123   : > { %4833 = vst [vmem:[#allocation35_spill] sm:$0xff] %v3558_v9  ;;  %4834 = vst [vmem:[#allocation36_spill] sm:$0xff] %v3563_v8  ;;  %v3566_v4 = vpop.eup %2678  ;;  %v1082_v53 = vmul.f32 %v3331_v19, %v1046_v15  ;;  %v3571_v9 = vadd.f32 %v3550_v11, %v1794_v5  ;;  %v1112_v31 = vadd.f32 %v1080_v51, %v980_v26 }
 0x124   : > { %v3573_v32 = vadd.f32 %v1166_v16, %v1098_v36  ;;  %v1164_v34 = vmul.f32 %v3356_v55, %v1128_v48  ;;  %v1195_v23 = vadd.f32 %v1163_v43, %v1095_v1  ;;  %v1795_v7 = vadd.f32 %v1763_v38, %v1695_v2 }
 0x125   : > { %v2442_v41 = vmul.f32 -1.442695, %v3571_v9  ;;  %v1180_v42 = vmul.f32 %v3356_v55, %v1144_v63  ;;  %v1211_v61 = vadd.f32 %v1179_v28, %v1111_v10  ;;  %v861_v14 = vmul.f32 %v3481_v13, %v3286_v18  ;;  %v933_v63 = vld [vmem:[#allocation2 + $0x60] sm:$0xff] }
 0x126   : > { %v1196_v8 = vadd.f32 %v1164_v34, %v1096_v58  ;;  %v3581_v5 = vadd.f32 %v3550_v11, %v1795_v7  ;;  %v877_v51 = vmul.f32 %v3486_v37, %v3290_v21  ;;  %v864_v26 = vmul.f32 %v3491_v44, %v3294_v24  ;;  %v1033_v21 = vld [vmem:[#allocation2 + $0x61] sm:$0xff]  ;;  %v2532_v34 = vpop.f32.mrf.mxu1 }
 0x127   : > { %2680 = vpow2.f32 %v2442_v41  ;;  %v1212_v16 = vadd.f32 %v1180_v42, %v1112_v31  ;;  %894 = vst.msk [vmem:[#allocation2 + $0x49] sm:$0xff] %vm339_vm1, %v861_v14  ;;  %v880_v48 = vmul.f32 %v3501_v59, %v3298_v27  ;;  %v862_v18 = vmul.f32 %v3508_v46, %v3302_v30 }
 0x128   : > { %v1114_v13 = vadd.f32 %v1082_v53, %v982_v49  ;;  %v1181_v1 = vmul.f32 %v3356_v55, %v1145_v60  ;;  %v2443_v10 = vmul.f32 -1.442695, %v3581_v5  ;;  %910 = vst.msk [vmem:[#allocation2 + $0x109] sm:$0xff] %vm339_vm1, %v877_v51  ;;  %897 = vst.msk [vmem:[#allocation2 + $0x69] sm:$0xff] %vm339_vm1, %v864_v26  ;;  %v878_v24 = vmul.f32 %v3516_v0, %v3306_v33  ;;  %v949_v33 = vld [vmem:[#allocation2 + $0x120] sm:$0xff] }
 0x129   : > { %v1182_v37 = vmul.f32 %v3356_v55, %v1146_v62  ;;  %v1280_v27 = vmul.f32 %v3365_v50, %v946_v20  ;;  %v1295_v30 = vadd.f32 %v3494_v45, %v1195_v23  ;;  %v1311_v46 = vadd.f32 %v3505_v25, %v1211_v61  ;;  %913 = vst.msk [vmem:[#allocation2 + $0x129] sm:$0xff] %vm339_vm1, %v880_v48  ;;  %v1049_v0 = vld [vmem:[#allocation2 + $0x121] sm:$0xff]  ;;  %v4839_v48 = vld [vmem:[#allocation32_spill] sm:$0xff] }
 0x12a   : > { %895 = vst.msk [vmem:[#allocation2 + $0x51] sm:$0xff] %vm339_vm1, %v862_v18  ;;  %v1380_v44 = vmul.f32 %v3387_v29, %v1046_v15  ;;  %v1479_v59 = vmul.f32 %v3457_v3, %v1145_v60  ;;  %v1296_v36 = vadd.f32 %v3528_v35, %v1196_v8  ;;  %2682 = vpow2.f32 %v2443_v10  ;;  %911 = vst.msk [vmem:[#allocation2 + $0x111] sm:$0xff] %vm339_vm1, %v878_v24  ;;  %v4840_v18 = vld [vmem:[#allocation35_spill] sm:$0xff]  ;;  %v589_v24 = vpop.f32.mrf.mxu0 }
 0x12b   : > { %v1480_v20 = vmul.f32 %v3457_v3, %v1146_v62  ;;  %v1312_v45 = vadd.f32 %v1280_v27, %v1212_v16  ;;  %v969_v25 = vmul.f32 %v3328_v17, %v933_v63  ;;  %v1069_v43 = vmul.f32 %v3331_v19, %v1033_v21 }
 0x12c   : > { %v3612_v53 = vadd.f32 %v1181_v1, %v3510_v39  ;;  %v3614_v15 = vadd.f32 %v1182_v37, %v1114_v13  ;;  %v3617_v28 = vmul.f32 %v3365_v50, %v933_v63  ;;  %v3620_v35 = vmul.f32 %v3387_v29, %v1033_v21  ;;  %v4841_v1 = vld [vmem:[#allocation33_spill] sm:$0xff]  ;;  %v653_v37 = vpop.f32.mrf.mxu1 }
 0x12d   : > { %v985_v8 = vmul.f32 %v3328_v17, %v949_v33  ;;  %v1085_v62 = vmul.f32 %v3331_v19, %v1049_v0  ;;  %v1395_v38 = vadd.f32 %v3497_v47, %v1295_v30  ;;  %v1411_v58 = vadd.f32 %v3513_v57, %v1311_v46 }
 0x12e   : > { %4835 = vst [vmem:[#allocation37_spill] sm:$0xff] %v3620_v35  ;;  %v3627_v2 = vmul.f32 %v3397_v12, %v933_v63  ;;  %v3630_v39 = vmul.f32 %v3451_v52, %v1033_v21  ;;  %v1396_v49 = vadd.f32 %v3531_v40, %v1296_v36  ;;  %v771_v31 = vadd.f32 1.0, %v3519_v6  ;;  %v4837_v40 = vld [vmem:[#allocation31_spill] sm:$0xff]  ;;  %v4842_v63 = vld [vmem:[#allocation9_spill] sm:$0xff] }
 0x12f   : > { %v3634_v23 = vadd.f32 %v1069_v43, %v969_v25  ;;  %v3637_v7 = vmul.f32 %v3365_v50, %v949_v33  ;;  %v1412_v60 = vadd.f32 %v1380_v44, %v1312_v45  ;;  %v787_v47 = vadd.f32 1.0, %v3524_v54  ;;  %v931_v14 = vld [vmem:[#allocation2 + $0x48] sm:$0xff] }
 0x130   : > { %v3641_v57 = vmul.f32 %v3387_v29, %v1049_v0  ;;  %v3644_v41 = vmul.f32 %v3397_v12, %v949_v33  ;;  %v3647_v42 = vmul.f32 %v3451_v52, %v1049_v0  ;;  %v769_v6 = vadd.f32 1.0, %v4837_v40  ;;  %v947_v26 = vld [vmem:[#allocation2 + $0x108] sm:$0xff] }
 0x131   : > { %v3650_v61 = vadd.f32 %v1085_v62, %v985_v8  ;;  %v1495_v51 = vadd.f32 %v3555_v22, %v1395_v38  ;;  %v1511_v16 = vadd.f32 %v1479_v59, %v1411_v58  ;;  %v785_v54 = vadd.f32 1.0, %v4839_v48  ;;  %v1031_v27 = vld [vmem:[#allocation2 + $0x49] sm:$0xff]  ;;  %v4844_v22 = vld [vmem:[#allocation34_spill] sm:$0xff] }
 0x132   : > { %4836 = vst [vmem:[#allocation38_spill] sm:$0xff] %v3641_v57  ;;  %v3655_v13 = vadd.f32 %v4840_v18, %v1396_v49  ;;  %2684 = vrcp.f32 %v771_v31  ;;  %v3658_v10 = vadd.f32 1.0, %v4841_v1  ;;  %v3661_v21 = vadd.f32 %v2532_v34, %v4842_v63  ;;  %v1047_v33 = vld [vmem:[#allocation2 + $0x109] sm:$0xff] }
 0x133   : > { %4838 = vst [vmem:[#allocation31_spill] sm:$0xff] %v3650_v61  ;;  %v3663_v30 = vadd.f32 %v1480_v20, %v1412_v60  ;;  %2686 = vrcp.f32 %v787_v47  ;;  %v3666_v46 = vadd.f32 1.0, %v4844_v22  ;;  %v3669_v44 = vadd.f32 1.0, %v3561_v56  ;;  %v934_v38 = vld [vmem:[#allocation2 + $0x68] sm:$0xff]  ;;  %v948_v61 = vld [vmem:[#allocation2 + $0x110] sm:$0xff] }
 0x134   : > { %4843 = vst [vmem:[#allocation32_spill] sm:$0xff] %v3661_v21  ;;  %v2681_v59 = vpop.eup %2680  ;;  %v1265_v36 = vmul.f32 %v3365_v50, %v931_v14  ;;  %v1281_v0 = vmul.f32 %v3365_v50, %v947_v26  ;;  %2688 = vrcp.f32 %v769_v6  ;;  %v3674_v45 = vadd.f32 1.0, %v3566_v4  ;;  %v1034_v58 = vld [vmem:[#allocation2 + $0x69] sm:$0xff] }
 0x135   : > { %v1961_v25 = vadd.f32 1.0, %v2681_v59  ;;  %2690 = vrcp.f32 %v785_v54  ;;  %v3677_v20 = vadd.f32 %v4842_v63, %v589_v24  ;;  %v3680_v43 = vadd.f32 %v4842_v63, %v653_v37  ;;  %v1133_v49 = vld [vmem:[#allocation2 + $0x62] sm:$0xff]  ;;  %v4849_v6 = vld [vmem:[#allocation36_spill] sm:$0xff] }
 0x136   : > { %4845 = vst [vmem:[#allocation35_spill] sm:$0xff] %v3674_v45  ;;  %v967_v56 = vmul.f32 %v3328_v17, %v931_v14  ;;  %v1067_v8 = vmul.f32 %v3331_v19, %v1031_v27  ;;  %v1564_v62 = vmul.f32 %v3397_v12, %v931_v14  ;;  %v3686_v4 = vmul.f32 -1.442695, %v3661_v21  ;;  %v3695_v24 = vld [vmem:[#allocation2 + $0x6a] sm:$0xff] }
 0x137   : > { %4846 = vst [vmem:[#allocation33_spill] sm:$0xff] %v3677_v20  ;;  %4847 = vst [vmem:[#allocation9_spill] sm:$0xff] %v3680_v43  ;;  %v2683_v31 = vpop.eup %2682  ;;  %2692 = vrcp.f32 %v1961_v25  ;;  %v983_v34 = vmul.f32 %v3328_v17, %v947_v26  ;;  %v1083_v60 = vmul.f32 %v3331_v19, %v1047_v33  ;;  %v1580_v47 = vmul.f32 %v3397_v12, %v947_v26 }
 0x138   : > { %4848 = vst [vmem:[#allocation34_spill] sm:$0xff] %v3686_v4  ;;  %v1962_v40 = vadd.f32 1.0, %v2683_v31  ;;  %v1297_v48 = vadd.f32 %v1265_v36, %v4849_v6  ;;  %v1596_v54 = vadd.f32 %v1564_v62, %v1495_v51  ;;  %v1313_v14 = vadd.f32 %v1281_v0, %v3612_v53  ;;  %4850 = vst [vmem:[#allocation36_spill] sm:$0xff] %v3695_v24  ;;  %v932_v36 = vld [vmem:[#allocation2 + $0x50] sm:$0xff] }
 0x139   : > { %v1612_v18 = vadd.f32 %v1580_v47, %v1511_v16  ;;  %v970_v1 = vmul.f32 %v3328_v17, %v934_v38  ;;  %v1070_v63 = vmul.f32 %v3331_v19, %v1034_v58  ;;  %v1169_v37 = vmul.f32 %v3356_v55, %v1133_v49  ;;  %v3706_v0 = vld [vmem:[#allocation2 + $0x4a] sm:$0xff] }
 0x13a   : > { %2694 = vrcp.f32 %v1962_v40  ;;  %v1365_v22 = vmul.f32 %v3387_v29, %v1031_v27  ;;  %v1664_v26 = vmul.f32 %v3451_v52, %v1031_v27  ;;  %v1381_v59 = vmul.f32 %v3387_v29, %v1047_v33 }
 0x13b   : > { %v3701_v51 = vadd.f32 %v1067_v8, %v967_v56  ;;  %v3703_v53 = vadd.f32 %v1083_v60, %v983_v34  ;;  %v1680_v16 = vmul.f32 %v3451_v52, %v1047_v33  ;;  %v3709_v25 = vmul.f32 -1.442695, %v3677_v20  ;;  %v1032_v60 = vld [vmem:[#allocation2 + $0x51] sm:$0xff] }
 0x13c   : > { %v1397_v62 = vadd.f32 %v1365_v22, %v1297_v48  ;;  %v1696_v31 = vadd.f32 %v1664_v26, %v1596_v54  ;;  %v3711_v47 = vadd.f32 %v1381_v59, %v1313_v14  ;;  %v3715_v27 = vmul.f32 %v3356_v55, %v3695_v24  ;;  %v3736_v48 = vld [vmem:[#allocation2 + $0x128] sm:$0xff]  ;;  %v3746_v22 = vld [vmem:[#allocation2 + $0x52] sm:$0xff] }
 0x13d   : > { %4851 = vst [vmem:[#allocation39_spill] sm:$0xff] %v3709_v25  ;;  %v3717_v56 = vadd.f32 %v1680_v16, %v1612_v18  ;;  %v3719_v8 = vadd.f32 %v1070_v63, %v970_v1  ;;  %v3722_v33 = vadd.f32 %v1169_v37, %v3634_v23  ;;  %v3725_v34 = vmul.f32 %v3365_v50, %v934_v38  ;;  %v4855_v63 = vld [vmem:[#allocation25_spill] sm:$0xff]  ;;  %v3751_v16 = vld [vmem:[#allocation2 + $0x129] sm:$0xff] }
 0x13e   : > { %v3731_v40 = vmul.f32 %v3387_v29, %v1034_v58  ;;  %v3734_v6 = vmul.f32 %v3457_v3, %v1133_v49  ;;  %v1266_v54 = vmul.f32 %v3365_v50, %v932_v36  ;;  %v1465_v23 = vmul.f32 %v3457_v3, %v3706_v0 }
 0x13f   : > { %4852 = vst [vmem:[#allocation40_spill] sm:$0xff] %v3722_v33  ;;  %v3741_v14 = vpop.eup %2684  ;;  %v1567_v18 = vmul.f32 %v3397_v12, %v934_v38  ;;  %v1667_v1 = vmul.f32 %v3451_v52, %v1034_v58  ;;  %v1766_v37 = vmul.f32 %v4855_v63, %v1133_v49  ;;  %v1565_v26 = vmul.f32 %v3397_v12, %v932_v36  ;;  %v3766_v33 = vld [vmem:[#allocation2 + $0x122] sm:$0xff] }
 0x140   : > { %4853 = vst [vmem:[#allocation41_spill] sm:$0xff] %v3731_v40  ;;  %4854 = vst [vmem:[#allocation42_spill] sm:$0xff] %v3734_v6  ;;  %v3749_v59 = vpop.eup %2686  ;;  %v1298_v20 = vadd.f32 %v1266_v54, %v3573_v32  ;;  %v1366_v21 = vmul.f32 %v3387_v29, %v1032_v60  ;;  %v1497_v25 = vadd.f32 %v1465_v23, %v1397_v62 }
 0x141   : > { %v1764_v38 = vmul.f32 %v4855_v63, %v3706_v0  ;;  %v3757_v4 = vpop.eup %2688  ;;  %v1767_v58 = vmul.f32 %v4855_v63, %v3695_v24  ;;  %v3764_v49 = vmul.f32 %v3328_v17, %v3736_v48  ;;  %4857 = vst [vmem:[#allocation43_spill] sm:$0xff] %v3766_v33  ;;  %v1597_v32 = vadd.f32 %v1565_v26, %v3655_v13 }
 0x142   : > { %v1665_v54 = vmul.f32 %v3451_v52, %v1032_v60  ;;  %v3770_v62 = vpop.eup %2690  ;;  %v1398_v23 = vadd.f32 %v1366_v21, %v1298_v20  ;;  %v1466_v45 = vmul.f32 %v3457_v3, %v3746_v22  ;;  %v1598_v43 = vadd.f32 %v3627_v2, %v1497_v25 }
 0x143   : > { %4856 = vst [vmem:[#allocation25_spill] sm:$0xff] %v3764_v49  ;;  %v1796_v6 = vadd.f32 %v1764_v38, %v1696_v31  ;;  %v1583_v24 = vmul.f32 %v3397_v12, %v3736_v48  ;;  %v3779_v40 = vmul.f32 %v3451_v52, %v3751_v16  ;;  %v1765_v26 = vmul.f32 %v4855_v63, %v3746_v22 }
 0x144   : > { %v1697_v13 = vadd.f32 %v1665_v54, %v1597_v32  ;;  %v2693_v57 = vpop.eup %2692  ;;  %v3785_v21 = vmul.f32 %v4855_v63, %v3766_v33  ;;  %v1498_v2 = vadd.f32 %v1466_v45, %v1398_v23  ;;  %v1698_v20 = vadd.f32 %v3630_v39, %v1598_v43  ;;  %v1048_v23 = vld [vmem:[#allocation2 + $0x111] sm:$0xff] }
 0x145   : > { %v3789_v25 = vadd.f32 %v3550_v11, %v1796_v6  ;;  %v2057_v31 = vmul.f32 %v2693_v57, %v3571_v9  ;;  %v3793_v38 = vmul.f32 %v3328_v17, %v932_v36  ;;  %v1282_v54 = vmul.f32 %v3365_v50, %v948_v61  ;;  %v1147_v39 = vld [vmem:[#allocation2 + $0x10a] sm:$0xff] }
 0x146   : > { %v1797_v32 = vadd.f32 %v1765_v26, %v1697_v13  ;;  %v3797_v35 = vmul.f32 %v3331_v19, %v1032_v60  ;;  %v1599_v49 = vadd.f32 %v1567_v18, %v1498_v2  ;;  %v1798_v33 = vadd.f32 %v1766_v37, %v1698_v20  ;;  %v1148_v60 = vld [vmem:[#allocation2 + $0x112] sm:$0xff] }
 0x147   : > { %v2444_v45 = vmul.f32 -1.442695, %v3789_v25  ;;  %v2695_v43 = vpop.eup %2694  ;;  %2089 = vst.msk [vmem:[%s3802_s16] sm:$0xff] %vm339_vm1, %v2057_v31  ;;  %v1167_v9 = vmul.f32 %v3356_v55, %v3706_v0  ;;  %v984_v36 = vmul.f32 %v3328_v17, %v948_v61  ;;  %v1314_v6 = vadd.f32 %v1282_v54, %v3614_v15 }
 0x148   : > { %v3809_v57 = vadd.f32 %v3550_v11, %v1797_v32  ;;  %v2058_v18 = vmul.f32 %v2695_v43, %v3581_v5  ;;  %v1699_v37 = vadd.f32 %v1667_v1, %v1599_v49  ;;  %v3815_v13 = vadd.f32 %v3550_v11, %v1798_v33 }
 0x149   : > { %2696 = vpow2.f32 %v2444_v45  ;;  %v2121_v2 = vsel %vm339_vm1, %v2057_v31, 0.0  ;;  %v1382_v0 = vmul.f32 %v3387_v29, %v1048_v23  ;;  %v1481_v20 = vmul.f32 %v3457_v3, %v1147_v39 }
 0x14a   : > { %v2445_v26 = vmul.f32 -1.442695, %v3809_v57  ;;  %2090 = vst.msk [vmem:[%s3802_s16 + $0x8] sm:$0xff] %vm339_vm1, %v2058_v18  ;;  %v1799_v32 = vadd.f32 %v1767_v58, %v1699_v37  ;;  %v2446_v15 = vmul.f32 -1.442695, %v3815_v13  ;;  %v2122_v5 = vsel %vm339_vm1, %v2058_v18, 0.0 }
 0x14b   : > { %v1482_v1 = vmul.f32 %v3457_v3, %v1148_v60  ;;  %v3826_v33 = vadd.f32 %v2122_v5, %v2121_v2  ;;  %v1414_v49 = vadd.f32 %v1382_v0, %v1314_v6  ;;  %v1513_v54 = vadd.f32 %v1481_v20, %v3711_v47  ;;  %v3837_v2 = vld [vmem:[#allocation2 + $0x12a] sm:$0xff]  ;;  %v4858_v0 = vld [vmem:[#allocation11_spill] sm:$0xff] }
 0x14c   : > { %2698 = vpow2.f32 %v2445_v26  ;;  %v3830_v31 = vadd.f32 %v3550_v11, %v1799_v32  ;;  %v1084_v45 = vmul.f32 %v3331_v19, %v1048_v23  ;;  %v1581_v58 = vmul.f32 %v3397_v12, %v948_v61  ;;  %v4859_v32 = vld [vmem:[#allocation13_spill] sm:$0xff] }
 0x14d   : > { %2700 = vpow2.f32 %v2446_v15  ;;  %v1514_v43 = vadd.f32 %v1482_v1, %v1414_v49  ;;  %v1614_v37 = vadd.f32 %v3644_v41, %v1513_v54  ;;  %v1681_v18 = vmul.f32 %v3451_v52, %v1048_v23  ;;  %v4860_v23 = vld [vmem:[#allocation14_spill] sm:$0xff] }
 0x14e   : > { %v1780_v26 = vmul.f32 %v4855_v63, %v1147_v39  ;;  %v2447_v6 = vmul.f32 -1.442695, %v3830_v31  ;;  %v1613_v47 = vadd.f32 %v1581_v58, %v3663_v30  ;;  %v867_v20 = vmul.f32 %v3741_v14, %v4858_v0  ;;  %v4861_v30 = vld [vmem:[#allocation15_spill] sm:$0xff] }
 0x14f   : > { %v883_v15 = vmul.f32 %v3749_v59, %v4859_v32  ;;  %v1615_v61 = vadd.f32 %v1583_v24, %v1514_v43  ;;  %v1714_v5 = vadd.f32 %v3647_v42, %v1614_v37  ;;  %v865_v1 = vmul.f32 %v3757_v4, %v4860_v23 }
 0x150   : > { %v1812_v41 = vadd.f32 %v1780_v26, %v3717_v56  ;;  %2702 = vpow2.f32 %v2447_v6  ;;  %v1713_v49 = vadd.f32 %v1681_v18, %v1613_v47  ;;  %v1781_v54 = vmul.f32 %v4855_v63, %v1148_v60  ;;  %900 = vst.msk [vmem:[#allocation2 + $0x91] sm:$0xff] %vm339_vm1, %v867_v20 }
 0x151   : > { %916 = vst.msk [vmem:[#allocation2 + $0x151] sm:$0xff] %vm339_vm1, %v883_v15  ;;  %v881_v14 = vmul.f32 %v3770_v62, %v4861_v30  ;;  %v1783_v24 = vmul.f32 %v4855_v63, %v3837_v2  ;;  %v1715_v42 = vadd.f32 %v3779_v40, %v1615_v61  ;;  %v1814_v56 = vadd.f32 %v3785_v21, %v1714_v5 }
 0x152   : > { %v3859_v4 = vadd.f32 %v3550_v11, %v1812_v41  ;;  %898 = vst.msk [vmem:[#allocation2 + $0x79] sm:$0xff] %vm339_vm1, %v865_v1  ;;  %v1168_v59 = vmul.f32 %v3356_v55, %v3746_v22  ;;  %v1183_v58 = vmul.f32 %v3356_v55, %v1147_v39  ;;  %v1813_v43 = vadd.f32 %v1781_v54, %v1713_v49 }
 0x153   : > { %914 = vst.msk [vmem:[#allocation2 + $0x139] sm:$0xff] %vm339_vm1, %v881_v14  ;;  %2704 = vrcp.f32 %v3658_v10  ;;  %v1100_v40 = vadd.f32 %v3797_v35, %v3793_v38  ;;  %v1815_v62 = vadd.f32 %v1783_v24, %v1715_v42  ;;  %v3870_v21 = vadd.f32 %v3550_v11, %v1814_v56 }
 0x154   : > { %v2460_v37 = vmul.f32 -1.442695, %v3859_v4  ;;  %v1199_v18 = vadd.f32 %v1167_v9, %v3701_v51  ;;  %v1116_v26 = vadd.f32 %v1084_v45, %v984_v36  ;;  %v3875_v22 = vadd.f32 %v3550_v11, %v1813_v43 }
 0x155   : > { %2706 = vrcp.f32 %v3666_v46  ;;  %v1184_v10 = vmul.f32 %v3356_v55, %v1148_v60  ;;  %v3880_v6 = vadd.f32 %v3550_v11, %v1815_v62  ;;  %v2462_v35 = vmul.f32 -1.442695, %v3870_v21 }
 0x156   : > { %v2697_v39 = vpop.eup %2696  ;;  %2708 = vpow2.f32 %v2460_v37  ;;  %v1215_v47 = vadd.f32 %v1183_v58, %v3703_v53  ;;  %v2461_v51 = vmul.f32 -1.442695, %v3875_v22  ;;  %v1086_v9 = vmul.f32 %v3331_v19, %v3751_v16 }
 0x157   : > { %v1963_v38 = vadd.f32 1.0, %v2697_v39  ;;  %2710 = vrcp.f32 %v3669_v44  ;;  %v1200_v46 = vadd.f32 %v1168_v59, %v1100_v40  ;;  %v2463_v36 = vmul.f32 -1.442695, %v3880_v6  ;;  %v3889_v60 = vld [vmem:[#allocation2 + $0x90] sm:$0xff] }
 0x158   : > { %2712 = vpow2.f32 %v2462_v35  ;;  %v3891_v45 = vld [vmem:[#allocation2 + $0x91] sm:$0xff]  ;;  %v1216_v20 = vadd.f32 %v1184_v10, %v1116_v26  ;;  %v973_v53 = vmul.f32 %v3328_v17, %v3889_v60  ;;  %v1284_v5 = vmul.f32 %v3365_v50, %v3736_v48  ;;  %v4865_v35 = vld [vmem:[#allocation38_spill] sm:$0xff] }
 0x159   : > { %v2699_v0 = vpop.eup %2698  ;;  %2714 = vrcp.f32 %v1963_v38  ;;  %v1073_v44 = vmul.f32 %v3331_v19, %v3891_v45  ;;  %v3897_v32 = vld [vmem:[#allocation2 + $0x150] sm:$0xff]  ;;  %v1299_v41 = vadd.f32 %v3617_v28, %v1199_v18  ;;  %v1315_v49 = vadd.f32 %v3637_v7, %v1215_v47  ;;  %v3907_v30 = vld [vmem:[#allocation2 + $0x78] sm:$0xff]  ;;  %v4862_v7 = vld [vmem:[#allocation43_spill] sm:$0xff] }
 0x15a   : > { %v3899_v15 = vld [vmem:[#allocation2 + $0x151] sm:$0xff]  ;;  %v2701_v61 = vpop.eup %2700  ;;  %v1964_v23 = vadd.f32 1.0, %v2699_v0  ;;  %2716 = vpow2.f32 %v2461_v51  ;;  %v3909_v14 = vld [vmem:[#allocation2 + $0x79] sm:$0xff]  ;;  %v1300_v24 = vadd.f32 %v3725_v34, %v1200_v46  ;;  %v989_v48 = vmul.f32 %v3328_v17, %v3897_v32 }
 0x15b   : > { %v1965_v1 = vadd.f32 1.0, %v2701_v61  ;;  %2718 = vpow2.f32 %v2463_v36  ;;  %v3905_v54 = vadd.f32 %v1073_v44, %v973_v53  ;;  %v1089_v28 = vmul.f32 %v3331_v19, %v3899_v15  ;;  %v3922_v58 = vld [vmem:[#allocation2 + $0x138] sm:$0xff] }
 0x15c   : > { %2720 = vrcp.f32 %v1964_v23  ;;  %v3918_v42 = vadd.f32 %v3715_v27, %v3719_v8  ;;  %v1185_v56 = vmul.f32 %v3356_v55, %v4862_v7  ;;  %v1316_v59 = vadd.f32 %v1284_v5, %v1216_v20  ;;  %v3924_v43 = vld [vmem:[#allocation2 + $0x139] sm:$0xff]  ;;  %v4867_v20 = vld [vmem:[#allocation36_spill] sm:$0xff]  ;;  %v4868_v5 = vld [vmem:[#allocation31_spill] sm:$0xff] }
 0x15d   : > { %2722 = vrcp.f32 %v1965_v1  ;;  %v2703_v34 = vpop.eup %2702  ;;  %v1384_v40 = vmul.f32 %v3387_v29, %v3751_v16  ;;  %v3928_v62 = vadd.f32 %v1089_v28, %v989_v48  ;;  %v971_v37 = vmul.f32 %v3328_v17, %v3907_v30  ;;  %v4863_v8 = vld [vmem:[#allocation25_spill] sm:$0xff]  ;;  %v4869_v28 = vld [vmem:[#allocation42_spill] sm:$0xff] }
 0x15e   : > { %v1071_v27 = vmul.f32 %v3331_v19, %v3909_v14  ;;  %v1118_v18 = vadd.f32 %v1086_v9, %v4863_v8  ;;  %v1966_v26 = vadd.f32 1.0, %v2703_v34  ;;  %v4864_v39 = vld [vmem:[#allocation37_spill] sm:$0xff]  ;;  %v1415_v38 = vadd.f32 %v4865_v35, %v1315_v49 }
 0x15f   : > { %v1399_v10 = vadd.f32 %v4864_v39, %v1299_v41  ;;  %v987_v16 = vmul.f32 %v3328_v17, %v3922_v58  ;;  %v1087_v46 = vmul.f32 %v3331_v19, %v3924_v43  ;;  %v4866_v36 = vld [vmem:[#allocation41_spill] sm:$0xff]  ;;  %v1468_v53 = vmul.f32 %v3457_v3, %v4867_v20 }
 0x160   : > { %v2705_v47 = vpop.eup %2704  ;;  %v3937_v51 = vadd.f32 %v1071_v27, %v971_v37  ;;  %v1400_v0 = vadd.f32 %v4866_v36, %v1300_v24  ;;  %v1186_v9 = vmul.f32 %v3356_v55, %v3837_v2  ;;  %2724 = vrcp.f32 %v1966_v26  ;;  %v4870_v37 = vld [vmem:[#allocation16_spill] sm:$0xff]  ;;  %v4871_v8 = vld [vmem:[#allocation17_spill] sm:$0xff] }
 0x161   : > { %v1416_v44 = vadd.f32 %v1384_v40, %v1316_v59  ;;  %v1217_v41 = vadd.f32 %v1185_v56, %v4868_v5  ;;  %v1483_v23 = vmul.f32 %v3457_v3, %v4862_v7  ;;  %v1484_v1 = vmul.f32 %v3457_v3, %v3837_v2  ;;  %v4872_v7 = vld [vmem:[#allocation9_spill] sm:$0xff] }
 0x162   : > { %v2707_v61 = vpop.eup %2706  ;;  %v3953_v49 = vadd.f32 %v1087_v46, %v987_v16  ;;  %v3955_v48 = vadd.f32 %v1186_v9, %v1118_v18  ;;  %v1499_v34 = vadd.f32 %v4869_v28, %v1399_v10  ;;  %v868_v27 = vmul.f32 %v2705_v47, %v4870_v37  ;;  %v4874_v10 = vld [vmem:[#allocation18_spill] sm:$0xff]  ;;  %v4877_v37 = vld [vmem:[#allocation35_spill] sm:$0xff] }
 0x163   : > { %v2709_v24 = vpop.eup %2708  ;;  %v884_v59 = vmul.f32 %v2707_v61, %v4871_v8  ;;  %v1515_v56 = vadd.f32 %v1483_v23, %v1415_v38  ;;  %v3960_v39 = vadd.f32 %v1468_v53, %v1400_v0  ;;  %v3963_v35 = vmul.f32 -1.442695, %v4872_v7 }
 0x164   : > { %v2711_v40 = vpop.eup %2710  ;;  %v1979_v26 = vadd.f32 1.0, %v2709_v24  ;;  %v3967_v16 = vmul.f32 %v3365_v50, %v3889_v60  ;;  %v3971_v18 = vmul.f32 %v3387_v29, %v3891_v45  ;;  %901 = vst.msk [vmem:[#allocation2 + $0x99] sm:$0xff] %vm339_vm1, %v868_v27  ;;  %v3976_v47 = vadd.f32 %v1484_v1, %v1416_v44 }
 0x165   : > { %4873 = vst [vmem:[#allocation11_spill] sm:$0xff] %v3963_v35  ;;  %v2713_v2 = vpop.eup %2712  ;;  %917 = vst.msk [vmem:[#allocation2 + $0x159] sm:$0xff] %vm339_vm1, %v884_v59  ;;  %v866_v38 = vmul.f32 %v2711_v40, %v4874_v10  ;;  %v3980_v0 = vmul.f32 %v3397_v12, %v3889_v60  ;;  %v3984_v20 = vmul.f32 %v3451_v52, %v3891_v45 }
 0x166   : > { %v2715_v46 = vpop.eup %2714  ;;  %v1981_v36 = vadd.f32 1.0, %v2713_v2  ;;  %2726 = vrcp.f32 %v1979_v26  ;;  %v3989_v61 = vmul.f32 %v3365_v50, %v3897_v32  ;;  %v3993_v44 = vmul.f32 %v3387_v29, %v3899_v15 }
 0x167   : > { %v2717_v53 = vpop.eup %2716  ;;  %v2059_v9 = vmul.f32 %v2715_v46, %v3789_v25  ;;  %v3997_v5 = vmul.f32 %v3397_v12, %v3897_v32  ;;  %899 = vst.msk [vmem:[#allocation2 + $0x81] sm:$0xff] %vm339_vm1, %v866_v38  ;;  %v4002_v25 = vmul.f32 %v3451_v52, %v3899_v15  ;;  %v1269_v23 = vmul.f32 %v3365_v50, %v3907_v30 }
 0x168   : > { %4875 = vst [vmem:[#allocation13_spill] sm:$0xff] %v3993_v44  ;;  %v2719_v60 = vpop.eup %2718  ;;  %v1980_v45 = vadd.f32 1.0, %v2717_v53  ;;  %2728 = vrcp.f32 %v1981_v36  ;;  %v1285_v28 = vmul.f32 %v3365_v50, %v3922_v58  ;;  %v1568_v59 = vmul.f32 %v3397_v12, %v3907_v30  ;;  %v4879_v36 = vld [vmem:[#allocation26_spill] sm:$0xff] }
 0x169   : > { %4876 = vst [vmem:[#allocation14_spill] sm:$0xff] %v4002_v25  ;;  %v2721_v1 = vpop.eup %2720  ;;  %2091 = vst.msk [vmem:[%s3802_s16 + $0x10] sm:$0xff] %vm339_vm1, %v2059_v9  ;;  %v2124_v24 = vsel %vm339_vm1, %v2059_v9, 0.0  ;;  %v1982_v32 = vadd.f32 1.0, %v2719_v60  ;;  %2730 = vrcp.f32 %v4877_v37  ;;  %v1369_v26 = vmul.f32 %v3387_v29, %v3909_v14  ;;  %v4880_v9 = vld [vmem:[#allocation27_spill] sm:$0xff] }
 0x16a   : > { %v2723_v27 = vpop.eup %2722  ;;  %v2060_v15 = vmul.f32 %v2721_v1, %v3809_v57  ;;  %v2125_v8 = vadd.f32 %v2124_v24, %v3826_v33  ;;  %2732 = vrcp.f32 %v1980_v45  ;;  %v1584_v2 = vmul.f32 %v3397_v12, %v3922_v58  ;;  %v4878_v57 = vld [vmem:[#allocation40_spill] sm:$0xff] }
 0x16b   : > { %v2061_v40 = vmul.f32 %v2723_v27, %v3815_v13  ;;  %2734 = vrcp.f32 %v1982_v32  ;;  %v1301_v38 = vadd.f32 %v1269_v23, %v4878_v57  ;;  %v1600_v33 = vadd.f32 %v1568_v59, %v1499_v34  ;;  %v1137_v46 = vld [vmem:[#allocation2 + $0x92] sm:$0xff]  ;;  %v4882_v24 = vld [vmem:[#allocation28_spill] sm:$0xff]  ;;  %v4055_v59 = vld [vmem:[#allocation2 + $0x9a] sm:$0xff] }
 0x16c   : > { %2092 = vst.msk [vmem:[%s3802_s16 + $0x18] sm:$0xff] %vm339_vm1, %v2060_v15  ;;  %v2126_v10 = vsel %vm339_vm1, %v2060_v15, 0.0  ;;  %2736 = vpow2.f32 %v4879_v36  ;;  %v1317_v30 = vadd.f32 %v1285_v28, %v1217_v41  ;;  %v1616_v53 = vadd.f32 %v1584_v2, %v1515_v56  ;;  %v4032_v1 = vld [vmem:[#allocation2 + $0x98] sm:$0xff]  ;;  %4884 = vst [vmem:[#allocation25_spill] sm:$0xff] %v4055_v59 }
 0x16d   : > { %2093 = vst.msk [vmem:[%s3802_s16 + $0x20] sm:$0xff] %vm339_vm1, %v2061_v40  ;;  %v2127_v13 = vadd.f32 %v2126_v10, %v2125_v8  ;;  %2738 = vpow2.f32 %v4880_v9  ;;  %v2725_v60 = vpop.eup %2724  ;;  %v2128_v58 = vsel %vm339_vm1, %v2061_v40, 0.0  ;;  %v1668_v45 = vmul.f32 %v3451_v52, %v3909_v14  ;;  %4881 = vst [vmem:[#allocation15_spill] sm:$0xff] %v4032_v1  ;;  %v4035_v23 = vld [vmem:[#allocation2 + $0x158] sm:$0xff] }
 0x16e   : > { %v1173_v34 = vmul.f32 %v3356_v55, %v1137_v46  ;;  %2740 = vpow2.f32 %v4882_v24  ;;  %v4039_v41 = vmul.f32 %v2725_v60, %v3830_v31  ;;  %v1385_v32 = vmul.f32 %v3387_v29, %v3924_v43  ;;  %v4047_v28 = vld [vmem:[#allocation2 + $0x99] sm:$0xff]  ;;  %v1136_v24 = vld [vmem:[#allocation2 + $0x82] sm:$0xff] }
 0x16f   : > { %v4041_v56 = vadd.f32 %v2128_v58, %v2127_v13  ;;  %v1684_v14 = vmul.f32 %v3451_v52, %v3924_v43  ;;  %4883 = vst [vmem:[#allocation43_spill] sm:$0xff] %v4047_v28  ;;  %v4049_v37 = vld [vmem:[#allocation2 + $0x159] sm:$0xff]  ;;  %v1401_v15 = vadd.f32 %v1369_v26, %v1301_v38  ;;  %v4053_v8 = vadd.f32 %v1668_v45, %v1600_v33 }
 0x170   : > { %v4051_v27 = vld [vmem:[#allocation2 + $0x152] sm:$0xff]  ;;  %v4058_v31 = vadd.f32 %v1173_v34, %v3905_v54  ;;  %2094 = vst.msk [vmem:[%s3802_s16 + $0x28] sm:$0xff] %vm339_vm1, %v4039_v41  ;;  %v4064_v43 = vadd.f32 %v1385_v32, %v1317_v30  ;;  %v1272_v10 = vmul.f32 %v3365_v50, %v4032_v1  ;;  %v990_v26 = vmul.f32 %v3328_v17, %v4035_v23  ;;  %v4072_v57 = vld [vmem:[#allocation2 + $0x15a] sm:$0xff] }
 0x171   : > { %v4886_v40 = vld [vmem:[#allocation29_spill] sm:$0xff]  ;;  %v4066_v2 = vadd.f32 %v1684_v14, %v1616_v53  ;;  %v4076_v54 = vmul.f32 %v3387_v29, %v4047_v28  ;;  %v4079_v38 = vmul.f32 %v3457_v3, %v1137_v46  ;;  %v1090_v33 = vmul.f32 %v3331_v19, %v4049_v37  ;;  %v936_v13 = vld [vmem:[#allocation2 + $0x80] sm:$0xff] }
 0x172   : > { %4885 = vst [vmem:[#allocation37_spill] sm:$0xff] %v4058_v31  ;;  %2742 = vpow2.f32 %v4886_v40  ;;  %v1189_v36 = vmul.f32 %v3356_v55, %v4051_v27  ;;  %v1036_v30 = vld [vmem:[#allocation2 + $0x81] sm:$0xff]  ;;  %v4087_v9 = vmul.f32 %v3457_v3, %v4055_v59  ;;  %v1571_v60 = vmul.f32 %v3397_v12, %v4032_v1 }
 0x173   : > { %4887 = vst [vmem:[#allocation38_spill] sm:$0xff] %v4066_v2  ;;  %v2727_v53 = vpop.eup %2726  ;;  %v4093_v58 = vmul.f32 %v3451_v52, %v4047_v28  ;;  %v1770_v45 = vmul.f32 %v4855_v63, %v1137_v46  ;;  %v1135_v34 = vld [vmem:[#allocation2 + $0x7a] sm:$0xff]  ;;  %v1122_v14 = vadd.f32 %v1090_v33, %v990_v26  ;;  %v1190_v40 = vmul.f32 %v3356_v55, %v4072_v57 }
 0x174   : > { %v4097_v32 = vmul.f32 %v2727_v53, %v3859_v4  ;;  %v4102_v31 = vadd.f32 %v1189_v36, %v3928_v62  ;;  %v4106_v1 = vmul.f32 %v4855_v63, %v4055_v59  ;;  %v4110_v46 = vmul.f32 %v3365_v50, %v4035_v23 }
 0x175   : > { %v2729_v7 = vpop.eup %2728  ;;  %v972_v4 = vmul.f32 %v3328_v17, %v936_v13  ;;  %v1072_v26 = vmul.f32 %v3331_v19, %v1036_v30  ;;  %v4120_v62 = vadd.f32 %v1190_v40, %v1122_v14  ;;  %v1171_v36 = vmul.f32 %v3356_v55, %v1135_v34 }
 0x176   : > { %4888 = vst [vmem:[#allocation41_spill] sm:$0xff] %v4097_v32  ;;  %4889 = vst [vmem:[#allocation36_spill] sm:$0xff] %v4102_v31  ;;  %v2731_v33 = vpop.eup %2730  ;;  %v4115_v53 = vmul.f32 %v2729_v7, %v3870_v21  ;;  %v1172_v31 = vmul.f32 %v3356_v55, %v1136_v24  ;;  %v1270_v35 = vmul.f32 %v3365_v50, %v936_v13 }
 0x177   : > { %4890 = vst [vmem:[#allocation31_spill] sm:$0xff] %v4110_v46  ;;  %2107 = vst.msk [vmem:[%s3802_s16 + $0x90] sm:$0xff] %vm339_vm1, %v4097_v32  ;;  %v2733_v59 = vpop.eup %2732  ;;  %v1104_v28 = vadd.f32 %v1072_v26, %v972_v4  ;;  %v1370_v25 = vmul.f32 %v3387_v29, %v1036_v30  ;;  %v1469_v44 = vmul.f32 %v3457_v3, %v1135_v34 }
 0x178   : > { %4891 = vst [vmem:[#allocation42_spill] sm:$0xff] %v4115_v53  ;;  %4892 = vst [vmem:[#allocation16_spill] sm:$0xff] %v4120_v62  ;;  %v2735_v21 = vpop.eup %2734  ;;  %v4128_v7 = vmul.f32 %v2733_v59, %v3875_v22  ;;  %v1203_v14 = vadd.f32 %v1171_v36, %v3937_v51  ;;  %v1470_v40 = vmul.f32 %v3457_v3, %v1136_v24 }
 0x179   : > { %2109 = vst.msk [vmem:[%s3802_s16 + $0xa0] sm:$0xff] %vm339_vm1, %v4115_v53  ;;  %v1569_v4 = vmul.f32 %v3397_v12, %v936_v13  ;;  %v2737_v26 = vpop.eup %2736  ;;  %v4137_v32 = vmul.f32 %v2735_v21, %v3880_v6  ;;  %v1204_v62 = vadd.f32 %v1172_v31, %v1104_v28  ;;  %v1302_v2 = vadd.f32 %v1270_v35, %v3918_v42 }
 0x17a   : > { %4893 = vst [vmem:[#allocation17_spill] sm:$0xff] %v4128_v7  ;;  %v1501_v46 = vadd.f32 %v1469_v44, %v1401_v15  ;;  %v2739_v22 = vpop.eup %2738  ;;  %2108 = vst.msk [vmem:[%s3802_s16 + $0x98] sm:$0xff] %vm339_vm1, %v4128_v7  ;;  %v1303_v59 = vadd.f32 %v3967_v16, %v1203_v14  ;;  %v1669_v36 = vmul.f32 %v3451_v52, %v1036_v30  ;;  %v4895_v16 = vld [vmem:[#allocation19_spill] sm:$0xff]  ;;  %v4920_v7 = vld [vmem:[#allocation32_spill] sm:$0xff] }
 0x17b   : > { %4894 = vst [vmem:[#allocation18_spill] sm:$0xff] %v4137_v32  ;;  %v1601_v51 = vadd.f32 %v1569_v4, %v3960_v39  ;;  %v1768_v13 = vmul.f32 %v4855_v63, %v1135_v34  ;;  %v2741_v53 = vpop.eup %2740  ;;  %2110 = vst.msk [vmem:[%s3802_s16 + $0xa8] sm:$0xff] %vm339_vm1, %v4137_v32  ;;  %v1304_v6 = vadd.f32 %v1272_v10, %v1204_v62  ;;  %v2130_v39 = vsel %vm339_vm1, %v4039_v41, 0.0 }
 0x17c   : > { %v1402_v28 = vadd.f32 %v1370_v25, %v1302_v2  ;;  %v1602_v42 = vadd.f32 %v3980_v0, %v1501_v46  ;;  %v1769_v35 = vmul.f32 %v4855_v63, %v1136_v24  ;;  %v882_v31 = vmul.f32 %v2731_v33, %v4895_v16 }
 0x17d   : > { %v1701_v44 = vadd.f32 %v1669_v36, %v1601_v51  ;;  %v1800_v15 = vadd.f32 %v1768_v13, %v4053_v8  ;;  %v4158_v14 = vadd.f32 %v2130_v39, %v4041_v56  ;;  %v775_v25 = vadd.f32 1.0, %v2737_v26 }
 0x17e   : > { %v1502_v34 = vadd.f32 %v1470_v40, %v1402_v28  ;;  %v1702_v21 = vadd.f32 %v3984_v20, %v1602_v42  ;;  %915 = vst.msk [vmem:[#allocation2 + $0x141] sm:$0xff] %vm339_vm1, %v882_v31  ;;  %v791_v8 = vadd.f32 1.0, %v2739_v22  ;;  %v773_v10 = vadd.f32 1.0, %v2741_v53 }
 0x17f   : > { %v2743_v30 = vpop.eup %2742  ;;  %v1801_v2 = vadd.f32 %v1769_v35, %v1701_v44  ;;  %v4161_v0 = vadd.f32 %v3550_v11, %v1800_v15  ;;  %2744 = vrcp.f32 %v775_v25  ;;  %v1403_v46 = vadd.f32 %v3971_v18, %v1303_v59 }
 0x180   : > { %v1603_v24 = vadd.f32 %v1571_v60, %v1502_v34  ;;  %v1802_v41 = vadd.f32 %v1770_v45, %v1702_v21  ;;  %2746 = vrcp.f32 %v791_v8  ;;  %v789_v56 = vadd.f32 1.0, %v2743_v30 }
 0x181   : > { %v4166_v33 = vadd.f32 %v3550_v11, %v1801_v2  ;;  %v2448_v20 = vmul.f32 -1.442695, %v4161_v0  ;;  %2748 = vrcp.f32 %v773_v10  ;;  %v4174_v53 = vadd.f32 %v4079_v38, %v1403_v46 }
 0x182   : > { %v1703_v62 = vadd.f32 %v4093_v58, %v1603_v24  ;;  %v4171_v40 = vadd.f32 %v3550_v11, %v1802_v41  ;;  %v4178_v60 = vmul.f32 %v3387_v29, %v4049_v37  ;;  %v1404_v45 = vadd.f32 %v4076_v54, %v1304_v6  ;;  %v4896_v41 = vld [vmem:[#allocation30_spill] sm:$0xff] }
 0x183   : > { %2750 = vpow2.f32 %v2448_v20  ;;  %v2449_v18 = vmul.f32 -1.442695, %v4166_v33  ;;  %v1487_v4 = vmul.f32 %v3457_v3, %v4051_v27  ;;  %v1587_v38 = vmul.f32 %v3397_v12, %v4035_v23 }
 0x184   : > { %v1803_v58 = vadd.f32 %v4106_v1, %v1703_v62  ;;  %v2450_v26 = vmul.f32 -1.442695, %v4171_v40  ;;  %2752 = vrcp.f32 %v789_v56  ;;  %v1687_v22 = vmul.f32 %v3451_v52, %v4049_v37  ;;  %v4898_v62 = vld [vmem:[#allocation38_spill] sm:$0xff] }
 0x185   : > { %2754 = vpow2.f32 %v2449_v18  ;;  %v4191_v59 = vadd.f32 %v4087_v9, %v1404_v45  ;;  %v1786_v54 = vmul.f32 %v4855_v63, %v4051_v27  ;;  %v4197_v51 = vmul.f32 %v4855_v63, %v4072_v57  ;;  %v952_v36 = vld [vmem:[#allocation2 + $0x140] sm:$0xff]  ;;  %v4899_v45 = vld [vmem:[#allocation13_spill] sm:$0xff] }
 0x186   : > { %v4200_v1 = vadd.f32 %v3550_v11, %v1803_v58  ;;  %2756 = vpow2.f32 %v2450_v26  ;;  %v1052_v23 = vld [vmem:[#allocation2 + $0x141] sm:$0xff]  ;;  %v988_v37 = vmul.f32 %v3328_v17, %v952_v36  ;;  %v1286_v27 = vmul.f32 %v3365_v50, %v952_v36 }
 0x187   : > { %v1151_v13 = vld [vmem:[#allocation2 + $0x13a] sm:$0xff]  ;;  %v1088_v6 = vmul.f32 %v3331_v19, %v1052_v23  ;;  %v1152_v9 = vld [vmem:[#allocation2 + $0x142] sm:$0xff]  ;;  %v1386_v11 = vmul.f32 %v3387_v29, %v1052_v23  ;;  %v1585_v34 = vmul.f32 %v3397_v12, %v952_v36  ;;  %v1685_v21 = vmul.f32 %v3451_v52, %v1052_v23 }
 0x188   : > { %v1187_v28 = vmul.f32 %v3356_v55, %v1151_v13  ;;  %v2451_v42 = vmul.f32 -1.442695, %v4200_v1  ;;  %v1188_v35 = vmul.f32 %v3356_v55, %v1152_v9  ;;  %v1485_v44 = vmul.f32 %v3457_v3, %v1151_v13  ;;  %v4900_v36 = vld [vmem:[#allocation14_spill] sm:$0xff] }
 0x189   : > { %v1120_v15 = vadd.f32 %v1088_v6, %v988_v37  ;;  %v1318_v16 = vadd.f32 %v1286_v27, %v3955_v48  ;;  %v1486_v31 = vmul.f32 %v3457_v3, %v1152_v9  ;;  %v1784_v10 = vmul.f32 %v4855_v63, %v1151_v13  ;;  %v4901_v13 = vld [vmem:[#allocation20_spill] sm:$0xff]  ;;  %v4902_v37 = vld [vmem:[#allocation34_spill] sm:$0xff]  ;;  %v4903_v27 = vld [vmem:[#allocation21_spill] sm:$0xff] }
 0x18a   : > { %v1219_v39 = vadd.f32 %v1187_v28, %v3953_v49  ;;  %2758 = vpow2.f32 %v2451_v42  ;;  %v1517_v30 = vadd.f32 %v1485_v44, %v4064_v43  ;;  %v1617_v24 = vadd.f32 %v1585_v34, %v3976_v47  ;;  %v4897_v43 = vld [vmem:[#allocation31_spill] sm:$0xff] }
 0x18b   : > { %v1220_v25 = vadd.f32 %v1188_v35, %v1120_v15  ;;  %v1418_v8 = vadd.f32 %v1386_v11, %v1318_v16  ;;  %v1785_v48 = vmul.f32 %v4855_v63, %v1152_v9  ;;  %2760 = vpow2.f32 %v4896_v41  ;;  %v4231_v9 = vld [vmem:[%s4763_s4] ss:$0 sm:$0xff] }
 0x18c   : > { %v1319_v2 = vadd.f32 %v3989_v61, %v1219_v39  ;;  %v1618_v49 = vadd.f32 %v3997_v5, %v1517_v30  ;;  %v2745_v46 = vpop.eup %2744  ;;  %v1816_v18 = vadd.f32 %v1784_v10, %v4898_v62  ;;  %v1717_v26 = vadd.f32 %v1685_v21, %v1617_v24  ;;  %v4904_v39 = vld [vmem:[#allocation22_spill] sm:$0xff] }
 0x18d   : > { %v1320_v20 = vadd.f32 %v4897_v43, %v1220_v25  ;;  %v1518_v56 = vadd.f32 %v1486_v31, %v1418_v8  ;;  %v2747_v61 = vpop.eup %2746  ;;  %v871_v47 = vmul.f32 %v2745_v46, %v4901_v13  ;;  %2762 = vpow2.f32 %v4902_v37  ;;  %v4906_v25 = vld [vmem:[#allocation11_spill] sm:$0xff] }
 0x18e   : > { %v1419_v58 = vadd.f32 %v4899_v45, %v1319_v2  ;;  %v1718_v23 = vadd.f32 %v4900_v36, %v1618_v49  ;;  %v2749_v5 = vpop.eup %2748  ;;  %v4234_v28 = vadd.f32 %v4231_v9, %v1816_v18  ;;  %v887_v42 = vmul.f32 %v2747_v61, %v4903_v27  ;;  %v4907_v8 = vld [vmem:[#allocation23_spill] sm:$0xff] }
 0x18f   : > { %v1619_v6 = vadd.f32 %v1587_v38, %v1518_v56  ;;  %v1817_v44 = vadd.f32 %v1785_v48, %v1717_v26  ;;  %904 = vst.msk [vmem:[#allocation2 + $0xc1] sm:$0xff] %vm339_vm1, %v871_v47  ;;  %v869_v16 = vmul.f32 %v2749_v5, %v4904_v39  ;;  %v4905_v38 = vld [vmem:[#allocation39_spill] sm:$0xff]  ;;  %v1420_v24 = vadd.f32 %v4178_v60, %v1320_v20 }
 0x190   : > { %v4237_v35 = vadd.f32 %v1487_v4, %v1419_v58  ;;  %v2751_v11 = vpop.eup %2750  ;;  %v1818_v15 = vadd.f32 %v1786_v54, %v1718_v23  ;;  %2764 = vpow2.f32 %v4905_v38  ;;  %v2464_v21 = vmul.f32 -1.442695, %v4234_v28  ;;  %920 = vst.msk [vmem:[#allocation2 + $0x181] sm:$0xff] %vm339_vm1, %v887_v42 }
 0x191   : > { %v2753_v31 = vpop.eup %2752  ;;  %v1967_v30 = vadd.f32 1.0, %v2751_v11  ;;  %v1719_v34 = vadd.f32 %v1687_v22, %v1619_v6  ;;  %2766 = vpow2.f32 %v4906_v25  ;;  %v4246_v2 = vadd.f32 %v4231_v9, %v1817_v44  ;;  %902 = vst.msk [vmem:[#allocation2 + $0xa9] sm:$0xff] %vm339_vm1, %v869_v16  ;;  %v2857_v25 = vld [vmem:[#allocation2 + $0xf0] sm:$0xff] }
 0x192   : > { %v2755_v4 = vpop.eup %2754  ;;  %v4249_v54 = vadd.f32 %v4231_v9, %v1818_v15  ;;  %v885_v10 = vmul.f32 %v2753_v31, %v4907_v8  ;;  %v1488_v49 = vmul.f32 %v3457_v3, %v4072_v57  ;;  %v2858_v8 = vld [vmem:[#allocation2 + $0xf1] sm:$0xff] }
 0x193   : > { %v2757_v22 = vpop.eup %2756  ;;  %v1968_v48 = vadd.f32 1.0, %v2755_v4  ;;  %2768 = vrcp.f32 %v1967_v30  ;;  %v1819_v41 = vadd.f32 %v4197_v51, %v1719_v34  ;;  %v2465_v43 = vmul.f32 -1.442695, %v4246_v2 }
 0x194   : > { %v1969_v46 = vadd.f32 1.0, %v2757_v22  ;;  %2770 = vpow2.f32 %v2464_v21  ;;  %v2466_v56 = vmul.f32 -1.442695, %v4249_v54  ;;  %918 = vst.msk [vmem:[#allocation2 + $0x169] sm:$0xff] %vm339_vm1, %v885_v10  ;;  %v4263_v60 = vadd.f32 %v1488_v49, %v1420_v24  ;;  %v2859_v49 = vld [vmem:[#allocation2 + $0xd8] sm:$0xff] }
 0x195   : > { %2772 = vrcp.f32 %v1968_v48  ;;  %v4261_v62 = vadd.f32 %v4231_v9, %v1819_v41  ;;  %v4283_v10 = vmul.f32 %v2858_v8, %v3451_v52  ;;  %v4287_v48 = vmul.f32 %v2859_v49, %v3365_v50  ;;  %v4909_v41 = vld [vmem:[#allocation15_spill] sm:$0xff] }
 0x196   : > { %4908 = vst [vmem:[#allocation35_spill] sm:$0xff] %v4263_v60  ;;  %2774 = vrcp.f32 %v1969_v46  ;;  %v974_v46 = vmul.f32 %v3328_v17, %v4909_v41 }
 0x197   : > { %v2759_v57 = vpop.eup %2758  ;;  %2776 = vpow2.f32 %v2465_v43  ;;  %v2467_v20 = vmul.f32 -1.442695, %v4261_v62  ;;  %v4910_v43 = vld [vmem:[#allocation43_spill] sm:$0xff] }
 0x198   : > { %v1970_v51 = vadd.f32 1.0, %v2759_v57  ;;  %2778 = vpow2.f32 %v2466_v56  ;;  %v2761_v18 = vpop.eup %2760  ;;  %v1074_v56 = vmul.f32 %v3331_v19, %v4910_v43  ;;  %v2860_v57 = vld [vmem:[#allocation2 + $0xd9] sm:$0xff]  ;;  %v939_v41 = vld [vmem:[#allocation2 + $0xa8] sm:$0xff] }
 0x199   : > { %2780 = vpow2.f32 %v2467_v20  ;;  %v776_v36 = vadd.f32 1.0, %v2761_v18  ;;  %v4294_v20 = vmul.f32 %v2860_v57, %v3387_v29  ;;  %v1273_v32 = vmul.f32 %v3365_v50, %v939_v41 }
 0x19a   : > { %2782 = vrcp.f32 %v1970_v51  ;;  %v2763_v45 = vpop.eup %2762  ;;  %v4297_v51 = vmul.f32 %v2859_v49, %v3397_v12 }
 0x19b   : > { %v792_v23 = vadd.f32 1.0, %v2763_v45  ;;  %2784 = vrcp.f32 %v776_v36  ;;  %v2861_v45 = vld [vmem:[#allocation2 + $0xf8] sm:$0xff] }
 0x19c   : > { %v2863_v36 = vld [vmem:[#allocation2 + $0xf2] sm:$0xff] }
 0x19d   : > { %v2765_v58 = vpop.eup %2764  ;;  %2786 = vrcp.f32 %v792_v23  ;;  %v4312_v23 = vmul.f32 %v2863_v36, %v4855_v63  ;;  %v955_v36 = vld [vmem:[#allocation2 + $0x168] sm:$0xff] }
 0x19e   : > { %v2767_v61 = vpop.eup %2766  ;;  %v774_v37 = vadd.f32 1.0, %v2765_v58  ;;  %v4306_v58 = vmul.f32 %v2861_v45, %v3397_v12 }
 0x19f   : > { %v790_v27 = vadd.f32 1.0, %v2767_v61  ;;  %v2862_v61 = vld [vmem:[#allocation2 + $0xf9] sm:$0xff] }
 0x1a0   : > { %v2769_v26 = vpop.eup %2768 }
 0x1a1   : > { %v2771_v13 = vpop.eup %2770  ;;  %v2063_v47 = vmul.f32 %v2769_v26, %v4161_v0  ;;  %v4309_v26 = vmul.f32 %v2862_v61, %v3451_v52 }
 0x1a2   : > { %v2773_v5 = vpop.eup %2772  ;;  %v1983_v6 = vadd.f32 1.0, %v2771_v13  ;;  %v941_v13 = vld [vmem:[#allocation2 + $0xc0] sm:$0xff] }
 0x1a3   : > { %v2775_v42 = vpop.eup %2774  ;;  %v2064_v11 = vmul.f32 %v2773_v5, %v4166_v33  ;;  %2095 = vst.msk [vmem:[%s3802_s16 + $0x30] sm:$0xff] %vm339_vm1, %v2063_v47  ;;  %v2132_v44 = vsel %vm339_vm1, %v2063_v47, 0.0  ;;  %v1041_v47 = vld [vmem:[#allocation2 + $0xc1] sm:$0xff] }
 0x1a4   : > { %v2777_v15 = vpop.eup %2776  ;;  %v2065_v39 = vmul.f32 %v2775_v42, %v4171_v40  ;;  %v2133_v0 = vadd.f32 %v2132_v44, %v4158_v14  ;;  %2788 = vrcp.f32 %v1983_v6  ;;  %v4279_v40 = vmul.f32 %v2857_v25, %v3397_v12  ;;  %v2864_v5 = vld [vmem:[#allocation2 + $0xfa] sm:$0xff] }
 0x1a5   : > { %v2779_v16 = vpop.eup %2778  ;;  %2096 = vst.msk [vmem:[%s3802_s16 + $0x38] sm:$0xff] %vm339_vm1, %v2064_v11  ;;  %v2134_v38 = vsel %vm339_vm1, %v2064_v11, 0.0  ;;  %v1984_v31 = vadd.f32 1.0, %v2777_v15  ;;  %2790 = vrcp.f32 %v774_v37  ;;  %v4317_v6 = vmul.f32 %v2864_v5, %v4855_v63  ;;  %v2866_v11 = vld [vmem:[#allocation2 + $0xe1] sm:$0xff]  ;;  %v4916_v5 = vld [vmem:[#allocation24_spill] sm:$0xff] }
 0x1a6   : > { %v2781_v30 = vpop.eup %2780  ;;  %2097 = vst.msk [vmem:[%s3802_s16 + $0x40] sm:$0xff] %vm339_vm1, %v2065_v39  ;;  %v2135_v33 = vadd.f32 %v2134_v38, %v2133_v0  ;;  %v1985_v34 = vadd.f32 1.0, %v2779_v16  ;;  %2792 = vrcp.f32 %v790_v27  ;;  %v2136_v14 = vsel %vm339_vm1, %v2065_v39, 0.0  ;;  %v2865_v27 = vld [vmem:[#allocation2 + $0xe0] sm:$0xff]  ;;  %v1556_v0 = vld [vmem:[#allocation2 + $0x198] sm:$0xff] }
 0x1a7   : > { %v2783_v21 = vpop.eup %2782  ;;  %v1986_v4 = vadd.f32 1.0, %v2781_v30  ;;  %2794 = vrcp.f32 %v1984_v31  ;;  %v4320_v42 = vmul.f32 %v2865_v27, %v3365_v50  ;;  %v4323_v44 = vmul.f32 %v2866_v11, %v3387_v29  ;;  %v2867_v15 = vld [vmem:[#allocation2 + $0xda] sm:$0xff]  ;;  %v2868_v31 = vld [vmem:[#allocation2 + $0xe2] sm:$0xff] }
 0x1a8   : > { %v2066_v24 = vmul.f32 %v2783_v21, %v4200_v1  ;;  %v2137_v22 = vadd.f32 %v2136_v14, %v2135_v33  ;;  %2796 = vrcp.f32 %v1985_v34  ;;  %v4300_v1 = vmul.f32 %v2860_v57, %v3451_v52  ;;  %v1557_v16 = vld [vmem:[#allocation2 + $0x1a0] sm:$0xff]  ;;  %v2785_v43 = vpop.eup %2784  ;;  %v4912_v57 = vld [vmem:[#allocation25_spill] sm:$0xff] }
 0x1a9   : > { %2798 = vrcp.f32 %v1986_v4  ;;  %v4326_v39 = vmul.f32 %v2867_v15, %v3457_v3  ;;  %v1656_v38 = vld [vmem:[#allocation2 + $0x199] sm:$0xff]  ;;  %v4329_v30 = vmul.f32 %v2868_v31, %v3457_v3  ;;  %v4332_v33 = vmul.f32 %v2865_v27, %v3397_v12  ;;  %v1657_v25 = vld [vmem:[#allocation2 + $0x1a1] sm:$0xff] }
 0x1aa   : > { %2098 = vst.msk [vmem:[%s3802_s16 + $0x48] sm:$0xff] %vm339_vm1, %v2066_v24  ;;  %v2138_v18 = vsel %vm339_vm1, %v2066_v24, 0.0  ;;  %v4335_v34 = vmul.f32 %v2866_v11, %v3451_v52  ;;  %v1106_v21 = vadd.f32 %v1074_v56, %v974_v46  ;;  %v1756_v14 = vld [vmem:[#allocation2 + $0x19a] sm:$0xff]  ;;  %v1757_v4 = vld [vmem:[#allocation2 + $0x1a2] sm:$0xff]  ;;  %v4338_v8 = vmul.f32 %v2867_v15, %v4855_v63  ;;  %v2787_v61 = vpop.eup %2786 }
 0x1ab   : > { %v4314_v37 = vadd.f32 %v2138_v18, %v2137_v22  ;;  %v4341_v24 = vmul.f32 %v2868_v31, %v4855_v63  ;;  %v977_v22 = vmul.f32 %v3328_v17, %v941_v13  ;;  %v1077_v49 = vmul.f32 %v3331_v19, %v1041_v47 }
 0x1ac   : > { %v1174_v18 = vmul.f32 %v3356_v55, %v4912_v57  ;;  %v4348_v46 = vmul.f32 %v3397_v12, %v1556_v0  ;;  %v4351_v56 = vmul.f32 %v3397_v12, %v1557_v16  ;;  %v4354_v45 = vmul.f32 %v3451_v52, %v1656_v38  ;;  %v1039_v38 = vld [vmem:[#allocation2 + $0xa9] sm:$0xff] }
 0x1ad   : > { %4911 = vst [vmem:[#allocation40_spill] sm:$0xff] %v4314_v37  ;;  %v872_v27 = vmul.f32 %v2785_v43, %v4916_v5  ;;  %v4358_v11 = vmul.f32 %v3451_v52, %v1657_v25  ;;  %v4361_v15 = vmul.f32 %v4855_v63, %v1756_v14  ;;  %v4364_v31 = vmul.f32 %v4855_v63, %v1757_v4 }
 0x1ae   : > { %4913 = vst [vmem:[#allocation26_spill] sm:$0xff] %v4348_v46  ;;  %4914 = vst [vmem:[#allocation27_spill] sm:$0xff] %v4351_v56  ;;  %v4366_v57 = vadd.f32 %v1174_v18, %v1106_v21  ;;  %v4369_v16 = vmul.f32 %v3365_v50, %v941_v13  ;;  %v888_v43 = vmul.f32 %v2787_v61, %v4920_v7  ;;  %v1055_v18 = vld [vmem:[#allocation2 + $0x169] sm:$0xff]  ;;  %v1255_v7 = vld [vmem:[#allocation2 + $0x180] sm:$0xff] }
 0x1af   : > { %4915 = vst [vmem:[#allocation28_spill] sm:$0xff] %v4354_v45  ;;  %4917 = vst [vmem:[#allocation29_spill] sm:$0xff] %v4358_v11  ;;  %v1109_v14 = vadd.f32 %v1077_v49, %v977_v22  ;;  %v4377_v4 = vmul.f32 %v3387_v29, %v1041_v47  ;;  %v4380_v21 = vmul.f32 %v3397_v12, %v941_v13  ;;  %v1355_v61 = vld [vmem:[#allocation2 + $0x181] sm:$0xff]  ;;  %v4922_v22 = vld [vmem:[#allocation33_spill] sm:$0xff] }
 0x1b0   : > { %4918 = vst [vmem:[#allocation19_spill] sm:$0xff] %v4361_v15  ;;  %4919 = vst [vmem:[#allocation30_spill] sm:$0xff] %v4364_v31  ;;  %v4384_v31 = vmul.f32 %v3451_v52, %v1041_v47  ;;  %v975_v15 = vmul.f32 %v3328_v17, %v939_v41  ;;  %v1075_v13 = vmul.f32 %v3331_v19, %v1039_v38  ;;  %v4923_v11 = vld [vmem:[#allocation9_spill] sm:$0xff] }
 0x1b1   : > { %v2789_v0 = vpop.eup %2788  ;;  %905 = vst.msk [vmem:[#allocation2 + $0xc9] sm:$0xff] %vm339_vm1, %v872_v27  ;;  %921 = vst.msk [vmem:[#allocation2 + $0x189] sm:$0xff] %vm339_vm1, %v888_v43  ;;  %v1572_v27 = vmul.f32 %v3397_v12, %v939_v41  ;;  %v991_v47 = vmul.f32 %v3328_v17, %v955_v36  ;;  %v4925_v43 = vld [vmem:[#allocation37_spill] sm:$0xff] }
 0x1b2   : > { %v2791_v5 = vpop.eup %2790  ;;  %v4374_v25 = vmul.f32 %v2789_v0, %v4234_v28  ;;  %v1289_v28 = vmul.f32 %v3365_v50, %v955_v36 }
 0x1b3   : > { %v2793_v37 = vpop.eup %2792  ;;  %v870_v49 = vmul.f32 %v2791_v5, %v4922_v22  ;;  %v1305_v5 = vadd.f32 %v1273_v32, %v4925_v43  ;;  %v1091_v22 = vmul.f32 %v3331_v19, %v1055_v18 }
 0x1b4   : > { %4921 = vst [vmem:[#allocation31_spill] sm:$0xff] %v4374_v25  ;;  %v2795_v0 = vpop.eup %2794  ;;  %2111 = vst.msk [vmem:[%s3802_s16 + $0xb0] sm:$0xff] %vm339_vm1, %v4374_v25  ;;  %v886_v45 = vmul.f32 %v2793_v37, %v4923_v11  ;;  %v1588_v25 = vmul.f32 %v3397_v12, %v955_v36  ;;  %v4408_v37 = vmul.f32 %v3365_v50, %v1255_v7 }
 0x1b5   : > { %v2797_v56 = vpop.eup %2796  ;;  %v4398_v46 = vmul.f32 %v2795_v0, %v4246_v2  ;;  %903 = vst.msk [vmem:[#allocation2 + $0xb1] sm:$0xff] %vm339_vm1, %v870_v49  ;;  %v4411_v2 = vmul.f32 %v3387_v29, %v1355_v61  ;;  %v1604_v11 = vadd.f32 %v1572_v27, %v4174_v53  ;;  %v1373_v36 = vmul.f32 %v3387_v29, %v1039_v38 }
 0x1b6   : > { %v2799_v60 = vpop.eup %2798  ;;  %v4405_v41 = vmul.f32 %v2797_v56, %v4249_v54  ;;  %4927 = vst [vmem:[#allocation14_spill] sm:$0xff] %v4408_v37  ;;  %919 = vst.msk [vmem:[#allocation2 + $0x171] sm:$0xff] %vm339_vm1, %v886_v45  ;;  %v4930_v54 = vld [vmem:[#allocation36_spill] sm:$0xff]  ;;  %v1620_v49 = vadd.f32 %v1588_v25, %v4237_v35  ;;  %v4428_v0 = vmul.f32 %v3397_v12, %v1255_v7 }
 0x1b7   : > { %4924 = vst [vmem:[#allocation38_spill] sm:$0xff] %v4398_v46  ;;  %4928 = vst [vmem:[#allocation20_spill] sm:$0xff] %v4411_v2  ;;  %v4416_v32 = vmul.f32 %v2799_v60, %v4261_v62  ;;  %v1321_v56 = vadd.f32 %v1289_v28, %v4930_v54  ;;  %v4431_v53 = vmul.f32 %v3451_v52, %v1355_v61 }
 0x1b8   : > { %4926 = vst [vmem:[#allocation13_spill] sm:$0xff] %v4405_v41  ;;  %2112 = vst.msk [vmem:[%s3802_s16 + $0xb8] sm:$0xff] %vm339_vm1, %v4398_v46  ;;  %v1107_v62 = vadd.f32 %v1075_v13, %v975_v15  ;;  %v1672_v60 = vmul.f32 %v3451_v52, %v1039_v38  ;;  %v1405_v45 = vadd.f32 %v1373_v36, %v1305_v5  ;;  %v942_v28 = vld [vmem:[#allocation2 + $0xc8] sm:$0xff] }
 0x1b9   : > { %4929 = vst [vmem:[#allocation34_spill] sm:$0xff] %v4416_v32  ;;  %2113 = vst.msk [vmem:[%s3802_s16 + $0xc0] sm:$0xff] %vm339_vm1, %v4405_v41  ;;  %v4437_v27 = vadd.f32 %v1091_v22, %v991_v47  ;;  %v1389_v35 = vmul.f32 %v3387_v29, %v1055_v18  ;;  %v1688_v25 = vmul.f32 %v3451_v52, %v1055_v18  ;;  %v1042_v43 = vld [vmem:[#allocation2 + $0xc9] sm:$0xff] }
 0x1ba   : > { %4931 = vst [vmem:[#allocation21_spill] sm:$0xff] %v4428_v0  ;;  %4932 = vst [vmem:[#allocation22_spill] sm:$0xff] %v4431_v53  ;;  %v1141_v7 = vld [vmem:[#allocation2 + $0xc2] sm:$0xff]  ;;  %v4441_v54 = vadd.f32 %v1672_v60, %v1604_v11  ;;  %v978_v61 = vmul.f32 %v3328_v17, %v942_v28  ;;  %v1078_v15 = vmul.f32 %v3331_v19, %v1042_v43  ;;  %v1142_v38 = vld [vmem:[#allocation2 + $0xca] sm:$0xff] }
 0x1bb   : > { %2114 = vst.msk [vmem:[%s3802_s16 + $0xc8] sm:$0xff] %vm339_vm1, %v4416_v32  ;;  %4933 = vst [vmem:[#allocation39_spill] sm:$0xff] %v4437_v27  ;;  %v1177_v13 = vmul.f32 %v3356_v55, %v1141_v7  ;;  %v4446_v32 = vadd.f32 %v1389_v35, %v1321_v56  ;;  %v4448_v47 = vadd.f32 %v1688_v25, %v1620_v49  ;;  %v1256_v22 = vld [vmem:[#allocation2 + $0x188] sm:$0xff] }
 0x1bc   : > { %v1178_v5 = vmul.f32 %v3356_v55, %v1142_v38  ;;  %v1276_v18 = vmul.f32 %v3365_v50, %v942_v28  ;;  %v1110_v36 = vadd.f32 %v1078_v15, %v978_v61  ;;  %v1376_v11 = vmul.f32 %v3387_v29, %v1042_v43  ;;  %v4454_v46 = vld [vmem:[#allocation2 + $0x189] sm:$0xff]  ;;  %v1140_v37 = vld [vmem:[#allocation2 + $0xb2] sm:$0xff] }
 0x1bd   : > { %4934 = vst [vmem:[#allocation11_spill] sm:$0xff] %v4446_v32  ;;  %4935 = vst [vmem:[#allocation23_spill] sm:$0xff] %v4448_v47  ;;  %v1209_v41 = vadd.f32 %v1177_v13, %v1109_v14  ;;  %v1475_v60 = vmul.f32 %v3457_v3, %v1141_v7  ;;  %v4456_v53 = vld [vmem:[#allocation2 + $0x182] sm:$0xff]  ;;  %v4458_v0 = vld [vmem:[#allocation2 + $0x18a] sm:$0xff]  ;;  %v1476_v56 = vmul.f32 %v3457_v3, %v1142_v38 }
 0x1be   : > { %4936 = vst [vmem:[#allocation15_spill] sm:$0xff] %v4454_v46  ;;  %4937 = vst [vmem:[#allocation43_spill] sm:$0xff] %v4456_v53  ;;  %v1575_v49 = vmul.f32 %v3397_v12, %v942_v28  ;;  %v1675_v35 = vmul.f32 %v3451_v52, %v1042_v43  ;;  %v1774_v25 = vmul.f32 %v4855_v63, %v1141_v7  ;;  %v940_v61 = vld [vmem:[#allocation2 + $0xb0] sm:$0xff] }
 0x1bf   : > { %4938 = vst [vmem:[#allocation25_spill] sm:$0xff] %v4458_v0  ;;  %v1040_v14 = vld [vmem:[#allocation2 + $0xb1] sm:$0xff]  ;;  %v1210_v15 = vadd.f32 %v1178_v5, %v1110_v36  ;;  %v1309_v13 = vadd.f32 %v4287_v48, %v1209_v41  ;;  %v1775_v47 = vmul.f32 %v4855_v63, %v1142_v38  ;;  %v4467_v2 = vmul.f32 %v3365_v50, %v1256_v22 }
 0x1c0   : > { %v1139_v32 = vld [vmem:[#allocation2 + $0xaa] sm:$0xff]  ;;  %v4471_v27 = vmul.f32 %v3387_v29, %v4454_v46  ;;  %v4475_v28 = vmul.f32 %v3457_v3, %v4456_v53  ;;  %v4479_v43 = vmul.f32 %v3457_v3, %v4458_v0  ;;  %v4482_v48 = vmul.f32 %v3397_v12, %v1256_v22 }
 0x1c1   : > { %4939 = vst [vmem:[#allocation24_spill] sm:$0xff] %v4467_v2  ;;  %v1310_v41 = vadd.f32 %v4320_v42, %v1210_v15  ;;  %v1409_v7 = vadd.f32 %v4294_v20, %v1309_v13  ;;  %v976_v38 = vmul.f32 %v3328_v17, %v940_v61  ;;  %v1076_v5 = vmul.f32 %v3331_v19, %v1040_v14 }
 0x1c2   : > { %4940 = vst [vmem:[#allocation32_spill] sm:$0xff] %v4471_v27  ;;  %4941 = vst [vmem:[#allocation33_spill] sm:$0xff] %v4475_v28  ;;  %v1175_v36 = vmul.f32 %v3356_v55, %v1139_v32  ;;  %v1176_v53 = vmul.f32 %v3356_v55, %v1140_v37  ;;  %v1274_v28 = vmul.f32 %v3365_v50, %v940_v61 }
 0x1c3   : > { %4942 = vst [vmem:[#allocation9_spill] sm:$0xff] %v4479_v43  ;;  %4943 = vst [vmem:[#allocation37_spill] sm:$0xff] %v4482_v48  ;;  %v1374_v0 = vmul.f32 %v3387_v29, %v1040_v14  ;;  %v1410_v43 = vadd.f32 %v4323_v44, %v1310_v41  ;;  %v1509_v22 = vadd.f32 %v4326_v39, %v1409_v7 }
 0x1c4   : > { %v1108_v48 = vadd.f32 %v1076_v5, %v976_v38  ;;  %v1473_v42 = vmul.f32 %v3457_v3, %v1139_v32  ;;  %v1207_v20 = vadd.f32 %v1175_v36, %v1107_v62  ;;  %v1306_v15 = vadd.f32 %v1274_v28, %v4366_v57  ;;  %v1156_v38 = vld [vmem:[#allocation2 + $0x172] sm:$0xff] }
 0x1c5   : > { %v1474_v13 = vmul.f32 %v3457_v3, %v1140_v37  ;;  %v1573_v27 = vmul.f32 %v3397_v12, %v940_v61  ;;  %v1510_v2 = vadd.f32 %v4329_v30, %v1410_v43  ;;  %v1610_v46 = vadd.f32 %v4279_v40, %v1509_v22 }
 0x1c6   : > { %v1208_v50 = vadd.f32 %v1176_v53, %v1108_v48  ;;  %v1505_v29 = vadd.f32 %v1473_v42, %v1405_v45  ;;  %v1307_v44 = vadd.f32 %v4369_v16, %v1207_v20  ;;  %v1406_v41 = vadd.f32 %v1374_v0, %v1306_v15 }
 0x1c7   : > { %v1605_v39 = vadd.f32 %v1573_v27, %v4191_v59  ;;  %v1673_v7 = vmul.f32 %v3451_v52, %v1040_v14  ;;  %v1611_v62 = vadd.f32 %v4306_v58, %v1510_v2  ;;  %v1710_v57 = vadd.f32 %v4283_v10, %v1610_v46  ;;  %v1155_v14 = vld [vmem:[#allocation2 + $0x16a] sm:$0xff] }
 0x1c8   : > { %v1308_v28 = vadd.f32 %v1276_v18, %v1208_v50  ;;  %v1606_v61 = vadd.f32 %v4380_v21, %v1505_v29  ;;  %v1407_v30 = vadd.f32 %v4377_v4, %v1307_v44  ;;  %v1506_v43 = vadd.f32 %v1474_v13, %v1406_v41  ;;  %v4945_v44 = vld [vmem:[#allocation10_spill] sm:$0xff] }
 0x1c9   : > { %v1705_v40 = vadd.f32 %v1673_v7, %v1605_v39  ;;  %v1772_v53 = vmul.f32 %v4855_v63, %v1139_v32  ;;  %v1711_v16 = vadd.f32 %v4309_v26, %v1611_v62  ;;  %v1810_v0 = vadd.f32 %v4312_v23, %v1710_v57  ;;  %v4946_v39 = vld [vmem:[#allocation15_spill] sm:$0xff] }
 0x1ca   : > { %v1408_v59 = vadd.f32 %v1376_v11, %v1308_v28  ;;  %v1706_v45 = vadd.f32 %v4384_v31, %v1606_v61  ;;  %v1507_v27 = vadd.f32 %v1475_v60, %v1407_v30  ;;  %v1607_v58 = vadd.f32 %v1575_v49, %v1506_v43  ;;  %v1056_v49 = vld [vmem:[#allocation2 + $0x171] sm:$0xff]  ;;  %v4948_v43 = vld [vmem:[#allocation14_spill] sm:$0xff] }
 0x1cb   : > { %v1773_v10 = vmul.f32 %v4855_v63, %v1140_v37  ;;  %v1804_v50 = vadd.f32 %v1772_v53, %v4441_v54  ;;  %v1811_v29 = vadd.f32 %v4317_v6, %v1711_v16  ;;  %v4515_v46 = vadd.f32 %v4231_v9, %v1810_v0  ;;  %v4947_v61 = vld [vmem:[#allocation16_spill] sm:$0xff] }
 0x1cc   : > { %v1508_v4 = vadd.f32 %v1476_v56, %v1408_v59  ;;  %v1806_v21 = vadd.f32 %v1774_v25, %v1706_v45  ;;  %v1608_v26 = vadd.f32 %v4297_v51, %v1507_v27  ;;  %v1707_v2 = vadd.f32 %v1675_v35, %v1607_v58  ;;  %v956_v56 = vld [vmem:[#allocation2 + $0x170] sm:$0xff]  ;;  %v4951_v59 = vld [vmem:[#allocation11_spill] sm:$0xff] }
 0x1cd   : > { %v1805_v23 = vadd.f32 %v1773_v10, %v1705_v40  ;;  %v4519_v32 = vadd.f32 %v4231_v9, %v1804_v50  ;;  %v4522_v31 = vadd.f32 %v4231_v9, %v1811_v29  ;;  %v2458_v37 = vmul.f32 -1.442695, %v4515_v46  ;;  %v4949_v40 = vld [vmem:[#allocation12_spill] sm:$0xff] }
 0x1ce   : > { %v1609_v54 = vadd.f32 %v4332_v33, %v1508_v4  ;;  %v4527_v6 = vadd.f32 %v4231_v9, %v1806_v21  ;;  %v1708_v18 = vadd.f32 %v4300_v1, %v1608_v26  ;;  %v1807_v11 = vadd.f32 %v1775_v47, %v1707_v2  ;;  %v4950_v16 = vld [vmem:[#allocation24_spill] sm:$0xff]  ;;  %v4954_v2 = vld [vmem:[#allocation35_spill] sm:$0xff] }
 0x1cf   : > { %v4531_v51 = vadd.f32 %v4231_v9, %v1805_v23  ;;  %v2452_v60 = vmul.f32 -1.442695, %v4519_v32  ;;  %2800 = vpow2.f32 %v2458_v37  ;;  %v2459_v35 = vmul.f32 -1.442695, %v4522_v31  ;;  %v4952_v10 = vld [vmem:[#allocation20_spill] sm:$0xff]  ;;  %v4955_v37 = vld [vmem:[#allocation21_spill] sm:$0xff] }
 0x1d0   : > { %v1709_v25 = vadd.f32 %v4335_v34, %v1609_v54  ;;  %v2454_v33 = vmul.f32 -1.442695, %v4527_v6  ;;  %v1808_v48 = vadd.f32 %v4338_v8, %v1708_v18  ;;  %v4539_v1 = vadd.f32 %v4231_v9, %v1807_v11  ;;  %v4953_v21 = vld [vmem:[#allocation32_spill] sm:$0xff]  ;;  %v4956_v11 = vld [vmem:[#allocation43_spill] sm:$0xff] }
 0x1d1   : > { %2802 = vpow2.f32 %v2452_v60  ;;  %v2453_v47 = vmul.f32 -1.442695, %v4531_v51  ;;  %v992_v36 = vmul.f32 %v3328_v17, %v956_v56  ;;  %v1092_v22 = vmul.f32 %v3331_v19, %v1056_v49 }
 0x1d2   : > { %2804 = vpow2.f32 %v2459_v35  ;;  %v1809_v5 = vadd.f32 %v4341_v24, %v1709_v25  ;;  %v4546_v34 = vadd.f32 %v4231_v9, %v1808_v48  ;;  %v2455_v8 = vmul.f32 -1.442695, %v4539_v1  ;;  %v4944_v24 = vld [vmem:[#allocation39_spill] sm:$0xff]  ;;  %v4959_v48 = vld [vmem:[#allocation9_spill] sm:$0xff] }
 0x1d3   : > { %2806 = vpow2.f32 %v2453_v47  ;;  %v1191_v42 = vmul.f32 %v3356_v55, %v1155_v14  ;;  %v1124_v15 = vadd.f32 %v1092_v22, %v992_v36  ;;  %v1192_v13 = vmul.f32 %v3356_v55, %v1156_v38  ;;  %v4958_v25 = vld [vmem:[#allocation23_spill] sm:$0xff] }
 0x1d4   : > { %v4551_v20 = vadd.f32 %v4231_v9, %v1809_v5  ;;  %2808 = vpow2.f32 %v2454_v33  ;;  %v2456_v17 = vmul.f32 -1.442695, %v4546_v34  ;;  %v1290_v41 = vmul.f32 %v4945_v44, %v956_v56  ;;  %v4964_v44 = vld [vmem:[#allocation27_spill] sm:$0xff] }
 0x1d5   : > { %2810 = vpow2.f32 %v2455_v8  ;;  %v1223_v19 = vadd.f32 %v1191_v42, %v4944_v24  ;;  %v1691_v7 = vmul.f32 %v3451_v52, %v4946_v39  ;;  %v1224_v57 = vadd.f32 %v1192_v13, %v1124_v15  ;;  %v4961_v8 = vld [vmem:[#allocation25_spill] sm:$0xff]  ;;  %v4963_v15 = vld [vmem:[#allocation26_spill] sm:$0xff] }
 0x1d6   : > { %v2457_v62 = vmul.f32 -1.442695, %v4551_v20  ;;  %v1489_v28 = vmul.f32 %v3457_v3, %v1155_v14  ;;  %2812 = vpow2.f32 %v2456_v17  ;;  %v1322_v30 = vadd.f32 %v1290_v41, %v4947_v61  ;;  %v4965_v61 = vld [vmem:[#allocation28_spill] sm:$0xff] }
 0x1d7   : > { %v1323_v55 = vadd.f32 %v4948_v43, %v1223_v19  ;;  %v1390_v53 = vmul.f32 %v4949_v40, %v1056_v49  ;;  %v1324_v0 = vadd.f32 %v4950_v16, %v1224_v57  ;;  %v1589_v27 = vmul.f32 %v3397_v12, %v956_v56  ;;  %v4957_v12 = vld [vmem:[#allocation33_spill] sm:$0xff] }
 0x1d8   : > { %2814 = vpow2.f32 %v2457_v62  ;;  %v1521_v45 = vadd.f32 %v1489_v28, %v4951_v59  ;;  %v1490_v29 = vmul.f32 %v3457_v3, %v1156_v38  ;;  %v1788_v4 = vmul.f32 %v4855_v63, %v1155_v14  ;;  %v4960_v14 = vld [vmem:[#allocation22_spill] sm:$0xff]  ;;  %v4966_v40 = vld [vmem:[#allocation29_spill] sm:$0xff] }
 0x1d9   : > { %v1422_v58 = vadd.f32 %v1390_v53, %v1322_v30  ;;  %v1423_v50 = vadd.f32 %v4952_v10, %v1323_v55  ;;  %v1424_v26 = vadd.f32 %v4953_v21, %v1324_v0  ;;  %v1621_v23 = vadd.f32 %v1589_v27, %v4954_v2  ;;  %v4967_v27 = vld [vmem:[#allocation19_spill] sm:$0xff] }
 0x1da   : > { %v1622_v54 = vadd.f32 %v4955_v37, %v1521_v45  ;;  %v1689_v18 = vmul.f32 %v3451_v52, %v1056_v49  ;;  %v1790_v60 = vmul.f32 %v4855_v63, %v4956_v11  ;;  %v1820_v33 = vadd.f32 %v1788_v4, %v4958_v25  ;;  %v4962_v52 = vld [vmem:[#allocation37_spill] sm:$0xff] }
 0x1db   : > { %v1522_v35 = vadd.f32 %v1490_v29, %v1422_v58  ;;  %v1523_v56 = vadd.f32 %v4957_v12, %v1423_v50  ;;  %v1524_v3 = vadd.f32 %v4959_v48, %v1424_v26  ;;  %v1789_v36 = vmul.f32 %v4855_v63, %v1156_v38  ;;  %v4968_v50 = vld [vmem:[#allocation30_spill] sm:$0xff] }
 0x1dc   : > { %v1721_v47 = vadd.f32 %v1689_v18, %v1621_v23  ;;  %v1722_v5 = vadd.f32 %v4960_v14, %v1622_v54  ;;  %v2801_v22 = vpop.eup %2800  ;;  %v1791_v42 = vmul.f32 %v4855_v63, %v4961_v8  ;;  %v4586_v17 = vadd.f32 %v4231_v9, %v1820_v33 }
 0x1dd   : > { %v1623_v49 = vadd.f32 %v4962_v52, %v1522_v35  ;;  %v1624_v13 = vadd.f32 %v4963_v15, %v1523_v56  ;;  %v1977_v19 = vadd.f32 1.0, %v2801_v22  ;;  %v1625_v41 = vadd.f32 %v4964_v44, %v1524_v3 }
 0x1de   : > { %v2803_v24 = vpop.eup %2802  ;;  %v1821_v39 = vadd.f32 %v1789_v36, %v1721_v47  ;;  %v1822_v62 = vadd.f32 %v1790_v60, %v1722_v5  ;;  %v2468_v63 = vmul.f32 -1.442695, %v4586_v17 }
 0x1df   : > { %v2805_v57 = vpop.eup %2804  ;;  %v1971_v28 = vadd.f32 1.0, %v2803_v24  ;;  %v1723_v38 = vadd.f32 %v1691_v7, %v1623_v49  ;;  %v1724_v30 = vadd.f32 %v4965_v61, %v1624_v13  ;;  %2816 = vrcp.f32 %v1977_v19 }
 0x1e0   : > { %v2807_v43 = vpop.eup %2806  ;;  %v1978_v55 = vadd.f32 1.0, %v2805_v57  ;;  %v1725_v53 = vadd.f32 %v4966_v40, %v1625_v41  ;;  %v4593_v16 = vadd.f32 %v4231_v9, %v1821_v39  ;;  %v4598_v4 = vadd.f32 %v4231_v9, %v1822_v62 }
 0x1e1   : > { %v2809_v0 = vpop.eup %2808  ;;  %v1972_v59 = vadd.f32 1.0, %v2807_v43  ;;  %2818 = vrcp.f32 %v1971_v28  ;;  %v1823_v45 = vadd.f32 %v1791_v42, %v1723_v38  ;;  %v1824_v58 = vadd.f32 %v4967_v27, %v1724_v30 }
 0x1e2   : > { %v2811_v10 = vpop.eup %2810  ;;  %2820 = vrcp.f32 %v1978_v55  ;;  %v1973_v7 = vadd.f32 1.0, %v2809_v0  ;;  %v1825_v29 = vadd.f32 %v4968_v50, %v1725_v53  ;;  %v2469_v11 = vmul.f32 -1.442695, %v4593_v16 }
 0x1e3   : > { %v1974_v21 = vadd.f32 1.0, %v2811_v10  ;;  %2822 = vrcp.f32 %v1972_v59  ;;  %v4601_v26 = vadd.f32 %v4231_v9, %v1823_v45  ;;  %v2813_v2 = vpop.eup %2812  ;;  %v4604_v23 = vadd.f32 %v4231_v9, %v1824_v58 }
 0x1e4   : > { %2824 = vrcp.f32 %v1973_v7  ;;  %v1975_v54 = vadd.f32 1.0, %v2813_v2  ;;  %v4607_v18 = vadd.f32 %v4231_v9, %v1825_v29  ;;  %v2470_v35 = vmul.f32 -1.442695, %v4598_v4  ;;  %v4970_v7 = vld [vmem:[#allocation41_spill] sm:$0xff] }
 0x1e5   : > { %v2815_v37 = vpop.eup %2814  ;;  %2826 = vrcp.f32 %v1974_v21  ;;  %v2471_v12 = vmul.f32 -1.442695, %v4601_v26  ;;  %v2472_v56 = vmul.f32 -1.442695, %v4604_v23  ;;  %v2156_v50 = vsel %vm339_vm1, %v4970_v7, 0.0  ;;  %v4971_v2 = vld [vmem:[#allocation17_spill] sm:$0xff] }
 0x1e6   : > { %v1976_v60 = vadd.f32 1.0, %v2815_v37  ;;  %2828 = vpow2.f32 %v2468_v63  ;;  %v2473_v25 = vmul.f32 -1.442695, %v4607_v18  ;;  %v2158_v37 = vsel %vm339_vm1, %v4971_v2, 0.0 }
 0x1e7   : > { %2830 = vrcp.f32 %v1975_v54 }
 0x1e8   : > { %2832 = vrcp.f32 %v1976_v60  ;;  %v4972_v60 = vld [vmem:[#allocation42_spill] sm:$0xff] }
 0x1e9   : > { %2834 = vpow2.f32 %v2469_v11 }
 0x1ea   : > { %2836 = vpow2.f32 %v2470_v35  ;;  %v2160_v35 = vsel %vm339_vm1, %v4972_v60, 0.0 }
 0x1eb   : > { %2838 = vpow2.f32 %v2471_v12 }
 0x1ec   : > { %2840 = vpow2.f32 %v2472_v56  ;;  %v2817_v9 = vpop.eup %2816 }
 0x1ed   : > { %2842 = vpow2.f32 %v2473_v25  ;;  %v2073_v48 = vmul.f32 %v2817_v9, %v4515_v46 }
 0x1ee   : > { %v2819_v33 = vpop.eup %2818 }
 0x1ef   : > { %v2821_v3 = vpop.eup %2820  ;;  %v2067_v47 = vmul.f32 %v2819_v33, %v4519_v32  ;;  %2105 = vst.msk [vmem:[%s3802_s16 + $0x80] sm:$0xff] %vm339_vm1, %v2073_v48  ;;  %v4969_v32 = vld [vmem:[#allocation40_spill] sm:$0xff]  ;;  %v2152_v45 = vsel %vm339_vm1, %v2073_v48, 0.0  ;;  %v4973_v33 = vld [vmem:[#allocation18_spill] sm:$0xff] }
 0x1f0   : > { %v2823_v14 = vpop.eup %2822  ;;  %v2074_v5 = vmul.f32 %v2821_v3, %v4522_v31  ;;  %v2162_v48 = vsel %vm339_vm1, %v4973_v33, 0.0 }
 0x1f1   : > { %v2825_v36 = vpop.eup %2824  ;;  %v2068_v22 = vmul.f32 %v2823_v14, %v4531_v51  ;;  %2099 = vst.msk [vmem:[%s3802_s16 + $0x50] sm:$0xff] %vm339_vm1, %v2067_v47  ;;  %v2140_v8 = vsel %vm339_vm1, %v2067_v47, 0.0 }
 0x1f2   : > { %v2827_v42 = vpop.eup %2826  ;;  %2106 = vst.msk [vmem:[%s3802_s16 + $0x88] sm:$0xff] %vm339_vm1, %v2074_v5  ;;  %v2069_v46 = vmul.f32 %v2825_v36, %v4527_v6  ;;  %v2141_v52 = vadd.f32 %v2140_v8, %v4969_v32  ;;  %v2154_v58 = vsel %vm339_vm1, %v2074_v5, 0.0  ;;  %v4974_v36 = vld [vmem:[#allocation31_spill] sm:$0xff]  ;;  %v4976_v32 = vld [vmem:[#allocation13_spill] sm:$0xff] }
 0x1f3   : > { %v2829_v49 = vpop.eup %2828  ;;  %v2070_v31 = vmul.f32 %v2827_v42, %v4539_v1  ;;  %2100 = vst.msk [vmem:[%s3802_s16 + $0x58] sm:$0xff] %vm339_vm1, %v2068_v22  ;;  %v2142_v51 = vsel %vm339_vm1, %v2068_v22, 0.0  ;;  %v4975_v42 = vld [vmem:[#allocation38_spill] sm:$0xff] }
 0x1f4   : > { %v2831_v15 = vpop.eup %2830  ;;  %2101 = vst.msk [vmem:[%s3802_s16 + $0x60] sm:$0xff] %vm339_vm1, %v2069_v46  ;;  %v2143_v13 = vadd.f32 %v2142_v51, %v2141_v52  ;;  %v1987_v24 = vadd.f32 1.0, %v2829_v49  ;;  %v2144_v6 = vsel %vm339_vm1, %v2069_v46, 0.0  ;;  %v2168_v52 = vsel %vm339_vm1, %v4976_v32, 0.0 }
 0x1f5   : > { %v2833_v19 = vpop.eup %2832  ;;  %v2071_v44 = vmul.f32 %v2831_v15, %v4546_v34  ;;  %2102 = vst.msk [vmem:[%s3802_s16 + $0x68] sm:$0xff] %vm339_vm1, %v2070_v31  ;;  %v2146_v1 = vsel %vm339_vm1, %v2070_v31, 0.0 }
 0x1f6   : > { %v2835_v41 = vpop.eup %2834  ;;  %v2072_v39 = vmul.f32 %v2833_v19, %v4551_v20  ;;  %2844 = vrcp.f32 %v1987_v24  ;;  %v2145_v62 = vadd.f32 %v2144_v6, %v2143_v13 }
 0x1f7   : > { %v2837_v57 = vpop.eup %2836  ;;  %2103 = vst.msk [vmem:[%s3802_s16 + $0x70] sm:$0xff] %vm339_vm1, %v2071_v44  ;;  %v1988_v28 = vadd.f32 1.0, %v2835_v41  ;;  %v2148_v38 = vsel %vm339_vm1, %v2071_v44, 0.0 }
 0x1f8   : > { %v2839_v61 = vpop.eup %2838  ;;  %2104 = vst.msk [vmem:[%s3802_s16 + $0x78] sm:$0xff] %vm339_vm1, %v2072_v39  ;;  %v1989_v34 = vadd.f32 1.0, %v2837_v57  ;;  %v2147_v30 = vadd.f32 %v2146_v1, %v2145_v62  ;;  %v2150_v55 = vsel %vm339_vm1, %v2072_v39, 0.0 }
 0x1f9   : > { %v2841_v63 = vpop.eup %2840  ;;  %v1990_v43 = vadd.f32 1.0, %v2839_v61  ;;  %2846 = vrcp.f32 %v1988_v28 }
 0x1fa   : > { %v2843_v40 = vpop.eup %2842  ;;  %v1991_v20 = vadd.f32 1.0, %v2841_v63  ;;  %2848 = vrcp.f32 %v1989_v34  ;;  %v2149_v53 = vadd.f32 %v2148_v38, %v2147_v30 }
 0x1fb   : > { %v1992_v0 = vadd.f32 1.0, %v2843_v40  ;;  %2850 = vrcp.f32 %v1990_v43 }
 0x1fc   : > { %2852 = vrcp.f32 %v1991_v20  ;;  %v2151_v59 = vadd.f32 %v2150_v55, %v2149_v53 }
 0x1fd   : > { %2854 = vrcp.f32 %v1992_v0 }
 0x1fe   : > { %v2153_v27 = vadd.f32 %v2152_v45, %v2151_v59 }
 0x200   : > { %v2155_v10 = vadd.f32 %v2154_v58, %v2153_v27 }
 0x202   : > { %v2157_v29 = vadd.f32 %v2156_v50, %v2155_v10 }
 0x203   : > { %v2845_v21 = vpop.eup %2844 }
 0x204   : > { %v2083_v54 = vmul.f32 %v2845_v21, %v4586_v17  ;;  %v2159_v11 = vadd.f32 %v2158_v37, %v2157_v29 }
 0x206   : > { %v2847_v12 = vpop.eup %2846  ;;  %2115 = vst.msk [vmem:[%s3802_s16 + $0xd0] sm:$0xff] %vm339_vm1, %v2083_v54  ;;  %v2161_v56 = vadd.f32 %v2160_v35, %v2159_v11 }
 0x207   : > { %v2849_v25 = vpop.eup %2848  ;;  %v2084_v9 = vmul.f32 %v2847_v12, %v4593_v16  ;;  %v2164_v16 = vsel %vm339_vm1, %v4974_v36, 0.0 }
 0x208   : > { %v2851_v17 = vpop.eup %2850  ;;  %v2085_v3 = vmul.f32 %v2849_v25, %v4598_v4  ;;  %v2163_v47 = vadd.f32 %v2162_v48, %v2161_v56 }
 0x209   : > { %v2853_v14 = vpop.eup %2852  ;;  %v2086_v5 = vmul.f32 %v2851_v17, %v4601_v26  ;;  %2116 = vst.msk [vmem:[%s3802_s16 + $0xd8] sm:$0xff] %vm339_vm1, %v2084_v9 }
 0x20a   : > { %v2855_v22 = vpop.eup %2854  ;;  %v2087_v8 = vmul.f32 %v2853_v14, %v4604_v23  ;;  %2117 = vst.msk [vmem:[%s3802_s16 + $0xe0] sm:$0xff] %vm339_vm1, %v2085_v3  ;;  %v2165_v4 = vadd.f32 %v2164_v16, %v2163_v47  ;;  %v2166_v23 = vsel %vm339_vm1, %v4975_v42, 0.0 }
 0x20b   : > { %v2088_v26 = vmul.f32 %v2855_v22, %v4607_v18  ;;  %2118 = vst.msk [vmem:[%s3802_s16 + $0xe8] sm:$0xff] %vm339_vm1, %v2086_v5 }
 0x20c   : > { %2119 = vst.msk [vmem:[%s3802_s16 + $0xf0] sm:$0xff] %vm339_vm1, %v2087_v8  ;;  %v2167_v46 = vadd.f32 %v2166_v23, %v2165_v4 }
 0x20d   : > { %2120 = vst.msk [vmem:[%s3802_s16 + $0xf8] sm:$0xff] %vm339_vm1, %v2088_v26 }
 0x20e   : > { %2882 = shalt.err (!%p2879_p5)
}
 0x20f   : > { %s2883_s16 = scalar_lea.hbm %s4673_s30, 4096  ;;  %s2887_s19 = scalar_lea.hbm %s4764_s5, 8192 }
 0x210   : > { %p2884_p6 = scmp.ne.s32.totalorder %s4673_s30, %s2883_s16  ;;  %p2888_p10 = scmp.lt.s32.totalorder %s4673_s30, %s4764_s5 }
 0x211   : > { %p2889_p11 = scmp.lt.s32.totalorder %s2887_s19, %s2883_s16 }
 0x212   : > { %p2885_p7 = pnand %p2884_p6, %p3057_p4 }
 0x213   : > { %p2890_p12 = por %p2889_p11, %p2888_p10 }
 0x214   : > { %p2886_p9 = pneg %p2885_p7 }
 0x216   : > { %p2891_p13 = pnand %p2890_p12, %p2886_p9 }
 0x218   : > { %2894 = shalt.err (!%p2891_p13)
}
 0x219   : > { %s2979_s11 = smov 128   ;;  %s2980_s12 = smov 8   ;;  %v2169_v18 = vadd.f32 %v2168_v52, %v2167_v46  ;;  %v4977_v49 = vld [vmem:[#allocation34_spill] sm:$0xff]  ;;  %v2172_v15 = vsel %vm339_vm1, %v2083_v54, 0.0  ;;  %v2174_v24 = vsel %vm339_vm1, %v2084_v9, 0.0  ;;  %v2176_v44 = vsel %vm339_vm1, %v2085_v3, 0.0 }
 0x21a   : > { %2537 = dma.vmem_to_hbm [thread:$0]  (%p3057_p4), %s4675_s20, 4096, %s4673_s30, %s2193_s8, %s2979_s11, %s2979_s11, %s2980_s12   ;;  %v2170_v31 = vsel %vm339_vm1, %v4977_v49, 0.0  ;;  %v2178_v1 = vsel %vm339_vm1, %v2086_v5, 0.0  ;;  %v2180_v39 = vsel %vm339_vm1, %v2087_v8, 0.0  ;;  %v2182_v57 = vsel %vm339_vm1, %v2088_v26, 0.0 }
 0x21b   : > { %v2171_v51 = vadd.f32 %v2170_v31, %v2169_v18  ;;  %s2477_s20 = sshll.u32 %s2967_s24, 4  ;;  %s318_s30 = scalar_lea.vmem [#allocation5], %s3728_s14  ;;  %vm2190_vm4 = vcmask 253952  }
 0x21c   : > { %s2228_s8 = sshll.u32 %s318_s30, 4  ;;  %s2226_s16 = scalar_lea.hbm %s4765_s6, %s2477_s20  ;;  %s2229_s8 = int_to_ptr.vmem [resolvable:$true] %s2228_s8 }
 0x21d   : > { %v2173_v13 = vadd.f32 %v2172_v15, %v2171_v51  ;;  %s2198_s17 = scalar_lea.sflag [#allocation6], %s3728_s14  ;;  %s2895_s18 = scalar_lea.vmem %s2229_s8, 16 }
 0x21e   : > { %p2896_p0 = scmp.ne.s32.totalorder %s2229_s8, %s2895_s18  ;;  %s2981_s19 = smov [#allocation5]  }
 0x21f   : > { %v2175_v19 = vadd.f32 %v2174_v24, %v2173_v13  ;;  %s2899_s27 = sshll.u32 %s2981_s19, 4  ;;  %s2900_s27 = int_to_ptr.vmem [resolvable:$false] %s2899_s27 }
 0x220   : > { %p2897_p1 = pnand %p2896_p0, %p3057_p4  ;;  %s2901_s24 = scalar_lea.vmem %s2900_s27, 32 }
 0x221   : > { %v2177_v6 = vadd.f32 %v2176_v44, %v2175_v19  ;;  %p2902_p3 = scmp.lt.s32.totalorder %s2229_s8, %s2900_s27  ;;  %p2903_p5 = scmp.lt.s32.totalorder %s2901_s24, %s2895_s18 }
 0x222   : > { %p2898_p2 = pneg %p2897_p1 }
 0x223   : > { %v2179_v41 = vadd.f32 %v2178_v1, %v2177_v6  ;;  %p2904_p6 = por %p2903_p5, %p2902_p3 }
 0x225   : > { %v2181_v62 = vadd.f32 %v2180_v39, %v2179_v41  ;;  %p2905_p7 = pnand %p2904_p6, %p2898_p2 }
 0x227   : > { %v2183_v28 = vadd.f32 %v2182_v57, %v2181_v62 }
 0x229   : > { %v2184_v38 = vrot.slane %v2183_v28, 4 }
 0x22b   : > { %v2185_v61 = vadd.f32 %v2184_v38, %v2183_v28 }
 0x22d   : > { %v2186_v34 = vrot.slane %v2185_v61, 2 }
 0x22f   : > { %v2187_v30 = vadd.f32 %v2186_v34, %v2185_v61 }
 0x231   : > { %v2188_v63 = vrot.slane %v2187_v30, 1 }
 0x233   : > { %v2189_v43 = vadd.f32 %v2188_v63, %v2187_v30 }
 0x235   : > { %2191 = vst.msk [vmem:[%s318_s30] sm:$0x1] %vm2190_vm4, %v2189_v43 }
 0x236   : > { %2908 = shalt.err (!%p2905_p7)
}
 0x237   : > { %s2909_s28 = scalar_lea.hbm %s2226_s16, 16  ;;  %s2913_s12 = scalar_lea.hbm %s4765_s6, 32 }
 0x238   : > { %p2910_p9 = scmp.ne.s32.totalorder %s2226_s16, %s2909_s28  ;;  %p2914_p12 = scmp.lt.s32.totalorder %s2226_s16, %s4765_s6 }
 0x239   : > { %p2915_p13 = scmp.lt.s32.totalorder %s2913_s12, %s2909_s28 }
 0x23a   : > { %p2911_p10 = pnand %p2910_p9, %p3057_p4 }
 0x23b   : > { %p2916_p0 = por %p2915_p13, %p2914_p12 }
 0x23c   : > { %p2912_p11 = pneg %p2911_p10 }
 0x23e   : > { %p2917_p1 = pnand %p2916_p0, %p2912_p11 }
 0x240   : > { %2920 = shalt.err (!%p2917_p1)
}
 0x241   : > { %2538 = dma.vmem_to_hbm [thread:$0]  (%p3057_p4), %s2229_s8, 16, %s2226_s16, %s2198_s17  }
 0x242 PF: > { %p2548_p2 = scmp.ge.s32.totalorder %s2975_s26, 2  ;;  %s2240_s13 = sand.u32 1, %s2955_s21  }
 0x243   : > { %s2241_s15 = scalar_lea.sflag [#allocation4], %s2240_s13 }
 0x244   : > { %p2542_p3 = pnand %p2548_p2, %p3064_p8 }
 0x246   : > { %p2543_p5 = pneg %p2542_p3 }
 0x248   : > { %2946 = dma.done.wait (%p2543_p5), %s2241_s15, 4096  }
 0x249   : > { %2948 = vsyncadd (%p2543_p5), %s2241_s15, 4294963200  ;;  %s2250_s18 = scalar_lea.sflag [#allocation6], %s2240_s13 }
 0x24a   : > { %2950 = dma.done.wait (%p2543_p5), %s2250_s18, 16  }
 0x24b   : > { %2952 = vsyncadd (%p2543_p5), %s2250_s18, 4294967280  ;;  %s23_s26 = sadd.s32 1, %s2975_s26   ;;  %s4978_s21 = smov %s2959_s22 }
 0x24c   : > { %p20_p6 = scmp.ge.s32.totalorder %s23_s26, 4   ;;  %s4979_s22 = smov %s2963_s23 }
 0x24d   : > { %s4980_s23 = smov %s3070_s10  ;;  %s4981_s24 = smov %s2971_s25 }
 0x24e   : > { %s4982_s25 = smov %s4984_s29  ;;  %22 = sbr.rel (!%p20_p6) target bundleno = 6 (0x6), region = 106 }
 0x253   :  { %2254 = vsyncpa [#allocation4], 1 }
 0x254   :  { %2256 = vsyncpa [#allocation4 + $0x1], 1 }
 0x255   :  { %2257 = vsyncpa [#allocation6], 1 }
 0x256   :  { %2259 = vsyncpa [#allocation6 + $0x1], 1 }

</bundles_post_ra>
